<compile_context>
chip_gen: v6e
topology: v6e:2x2x1
jax: 0.10.0
libtpu: 0.0.40
codegen_flags: <defaults>
</compile_context>

<pallas_src>
import functools

import jax
import jax.numpy as jnp
from jax.experimental import pallas as pl
from jax.experimental.pallas import tpu as pltpu


def _round_up(a: int, b: int) -> int:
    return (a + b - 1) // b * b


def _snn_kernel(w_ref, xr_ref, xct_ref, yr_ref, yc_ref, sqr_ref, sqc_ref,
                fracs_ref, keep_ref,
                top_acc, bot_acc, cnt_acc,
                *, eps: float, n: int, tq: int, tk: int):
    i = pl.program_id(0)           # row tile
    j = pl.program_id(1)           # column (reduction) tile
    nj = pl.num_programs(1)

    @pl.when(j == 0)
    def _():
        top_acc[...] = jnp.zeros_like(top_acc)
        bot_acc[...] = jnp.zeros_like(bot_acc)
        cnt_acc[...] = jnp.zeros_like(cnt_acc)

    w = w_ref[0, 0]                                   # temperature weight
    xr = xr_ref[...]                                  # (tq, d)
    xct = xct_ref[...]                                # (d, tk)  pre-transposed

    # Pairwise squared distances via the Gram tile (MXU) + precomputed norms.
    dots = jnp.dot(xr, xct, preferred_element_type=jnp.float32)      # (tq, tk)
    d2 = jnp.maximum(sqr_ref[...] + sqc_ref[...] - 2.0 * dots, 0.0)
    dist = jnp.sqrt(d2)                                              # EUP
    expo = jnp.exp(-dist * w)                                        # EUP

    # Per-tile masks from global indices: drop padded columns and the diagonal.
    grow = i * tq + jax.lax.broadcasted_iota(jnp.int32, (tq, tk), 0)
    gcol = j * tk + jax.lax.broadcasted_iota(jnp.int32, (tq, tk), 1)
    valid = jnp.logical_and(gcol < n, grow != gcol)
    same = jnp.logical_and(yr_ref[...] == yc_ref[...], valid)        # (tq, tk)

    expo = jnp.where(valid, expo, 0.0)
    top_acc[...] += jnp.sum(jnp.where(same, expo, 0.0), axis=1, keepdims=True)
    bot_acc[...] += jnp.sum(expo, axis=1, keepdims=True)
    cnt_acc[...] += jnp.sum(same.astype(jnp.float32), axis=1, keepdims=True)

    @pl.when(j == nj - 1)
    def _():
        keep = cnt_acc[...] > 0.0                     # rows with a same-class peer
        fr = jnp.log(top_acc[...]) - jnp.log(bot_acc[...] + eps)
        # select (not multiply): avoids -inf * 0 -> NaN for dropped rows
        fracs_ref[...] = jnp.where(keep, fr, 0.0)
        keep_ref[...] = keep.astype(jnp.float32)


def soft_nearest_neighbours_loss(x, y, temperature_init: float = 0.1,
                                 eps: float = 1e-8, block: int = 512):
    """Pallas implementation of SoftNearestNeighbours().forward() (cosine=False)."""
    x = jnp.asarray(x, jnp.float32)
    y = jnp.asarray(y, jnp.int32)
    n, d = x.shape

    # Tile size: multiple of 128, capped by the (padded) problem size.
    t = max(128, min(block, _round_up(n, 128)))
    n_pad = _round_up(n, t)
    d_pad = _round_up(d, 128)

    # Padded operands (zeros contribute nothing to dots / norms; padded columns
    # are masked inside the kernel, padded rows are sliced off afterwards).
    x_pad = jnp.zeros((n_pad, d_pad), jnp.float32).at[:n, :d].set(x)
    xT_pad = x_pad.T                                   # (d_pad, n_pad) for col tiles
    sq = jnp.sum(x_pad * x_pad, axis=1)                # (n_pad,)
    sq_row = sq[:, None]                               # (n_pad, 1)
    sq_col = sq[None, :]                               # (1, n_pad)
    y_pad = jnp.full((n_pad,), -1, jnp.int32).at[:n].set(y)
    y_row = y_pad[:, None]
    y_col = y_pad[None, :]

    # Learnable temperature weight (deterministic init = 1/temperature_init).
    w = jnp.full((1, 1), 1.0 / temperature_init, jnp.float32)

    grid = (n_pad // t, n_pad // t)
    kernel = functools.partial(_snn_kernel, eps=float(eps), n=n, tq=t, tk=t)

    fracs, keep = pl.pallas_call(
        kernel,
        out_shape=(jax.ShapeDtypeStruct((n_pad, 1), jnp.float32),
                   jax.ShapeDtypeStruct((n_pad, 1), jnp.float32)),
        grid_spec=pltpu.PrefetchScalarGridSpec(
            num_scalar_prefetch=0,
            grid=grid,
            in_specs=[
                pl.BlockSpec(memory_space=pltpu.MemorySpace.SMEM),     # w scalar
                pl.BlockSpec((t, d_pad), lambda i, j: (i, 0)),         # x row tile
                pl.BlockSpec((d_pad, t), lambda i, j: (0, j)),         # x^T col tile
                pl.BlockSpec((t, 1), lambda i, j: (i, 0)),             # y rows
                pl.BlockSpec((1, t), lambda i, j: (0, j)),             # y cols
                pl.BlockSpec((t, 1), lambda i, j: (i, 0)),             # |x|^2 rows
                pl.BlockSpec((1, t), lambda i, j: (0, j)),             # |x|^2 cols
            ],
            out_specs=[
                pl.BlockSpec((t, 1), lambda i, j: (i, 0)),             # fracs
                pl.BlockSpec((t, 1), lambda i, j: (i, 0)),             # keep
            ],
            scratch_shapes=[pltpu.VMEM((t, 1), jnp.float32)] * 3,      # top/bot/cnt
        ),
        compiler_params=pltpu.CompilerParams(
            dimension_semantics=("parallel", "arbitrary")),
        cost_estimate=pl.CostEstimate(
            flops=2 * n_pad * n_pad * d_pad,
            transcendentals=2 * n_pad * n_pad,
            bytes_accessed=4 * (n_pad * d_pad * (1 + n_pad // t) + 6 * n_pad)),
    )(w, x_pad, xT_pad, y_row, y_col, sq_row, sq_col)

    fracs = fracs[:n, 0]
    keep = keep[:n, 0]
    num_kept = jnp.sum(keep)
    # Guarded divide: reference would 0/0-NaN if every class is a singleton.
    return -jnp.sum(fracs) / jnp.maximum(num_kept, 1.0)


def _reference_loss(x, y, temperature_init=0.1, eps=1e-8):
    """Plain-JAX mirror of the PyTorch forward for verification."""
    w = 1.0 / temperature_init
    n = x.shape[0]
    sq = jnp.sum(x * x, axis=1)
    d2 = jnp.maximum(sq[:, None] + sq[None, :] - 2.0 * (x @ x.T), 0.0)
    dist = jnp.sqrt(d2)
    expo = jnp.exp(-dist * w)
    same = (y[:, None] == y[None, :])
    offdiag = ~jnp.eye(n, dtype=bool)
    top = jnp.sum(jnp.where(same & offdiag, expo, 0.0), axis=1)
    bot = jnp.sum(jnp.where(offdiag, expo, 0.0), axis=1)
    keep = jnp.sum((same & offdiag).astype(jnp.float32), axis=1) > 0
    fracs = jnp.where(keep, jnp.log(top) - jnp.log(bot + eps), 0.0)
    return -jnp.sum(fracs) / jnp.maximum(jnp.sum(keep.astype(jnp.float32)), 1.0)


if __name__ == "__main__":
    key = jax.random.PRNGKey(0)
    k1, k2 = jax.random.split(key)

    # Test 1: tiny demo shape (single tile, heavy padding path).
    n, d = 8, 32
    x = jax.random.normal(k1, (n, d), dtype=jnp.float32)
    y = jnp.array([0, 0, 1, 1, 0, 1, 0, 1], dtype=jnp.int32)
    loss = soft_nearest_neighbours_loss(x, y, temperature_init=0.1, eps=1e-8)
    loss = jax.block_until_ready(loss)
    ref = _reference_loss(x, y, temperature_init=0.1, eps=1e-8)
    assert jnp.isfinite(loss), "kernel produced non-finite loss"
    assert jnp.allclose(loss, ref, rtol=1e-4, atol=1e-4), (loss, ref)

    # Test 2: unaligned n with a multi-tile grid (exercises tiling + accumulation).
    n2, d2 = 300, 48
    x2 = 0.1 * jax.random.normal(k2, (n2, d2), dtype=jnp.float32)
    y2 = jnp.arange(n2, dtype=jnp.int32) % 4
    loss2 = soft_nearest_neighbours_loss(x2, y2, temperature_init=0.5, eps=1e-8,
                                         block=128)
    loss2 = jax.block_until_ready(loss2)
    ref2 = _reference_loss(x2, y2, temperature_init=0.5, eps=1e-8)
    assert jnp.isfinite(loss2), "kernel produced non-finite loss (tiled)"
    assert jnp.allclose(loss2, ref2, rtol=1e-4, atol=1e-4), (loss2, ref2)

    print("KERNEL_OK")
</pallas_src>

<mosaic_0001>
module attributes {stable_mosaic.version = 11 : i64} {
  func.func @_snn_kernel(%arg0: i32, %arg1: i32, %arg2: memref<1x1xf32, #tpu.memory_space<smem>>, %arg3: memref<128x128xf32, #tpu.memory_space<vmem>>, %arg4: memref<128x128xf32, #tpu.memory_space<vmem>>, %arg5: memref<128x1xi32, #tpu.memory_space<vmem>>, %arg6: memref<1x128xi32, #tpu.memory_space<vmem>>, %arg7: memref<128x1xf32, #tpu.memory_space<vmem>>, %arg8: memref<1x128xf32, #tpu.memory_space<vmem>>, %arg9: memref<128x1xf32, #tpu.memory_space<vmem>>, %arg10: memref<128x1xf32, #tpu.memory_space<vmem>>, %arg11: memref<128x1xf32, #tpu.memory_space<vmem>>, %arg12: memref<128x1xf32, #tpu.memory_space<vmem>>, %arg13: memref<128x1xf32, #tpu.memory_space<vmem>>) attributes {dimension_semantics = [#tpu.dimension_semantics<parallel>, #tpu.dimension_semantics<arbitrary>], iteration_bounds = array<i64: 1, 1>, scalar_prefetch = 0 : i64, scratch_operands = 3 : i64, tpu.core_type = #tpu.core_type<tc>, window_params = [{transform_indices = @transform_0, window_bounds = array<i64: 1, 1>}, {transform_indices = @transform_1, window_bounds = array<i64: 128, 128>}, {transform_indices = @transform_2, window_bounds = array<i64: 128, 128>}, {transform_indices = @transform_3, window_bounds = array<i64: 128, 1>}, {transform_indices = @transform_4, window_bounds = array<i64: 1, 128>}, {transform_indices = @transform_5, window_bounds = array<i64: 128, 1>}, {transform_indices = @transform_6, window_bounds = array<i64: 1, 128>}, {transform_indices = @transform_7, window_bounds = array<i64: 128, 1>}, {transform_indices = @transform_8, window_bounds = array<i64: 128, 1>}]} {
    %c0_i32 = arith.constant 0 : i32
    %0 = arith.cmpi eq, %arg1, %c0_i32 : i32
    %1 = arith.extui %0 : i1 to i32
    %c0_i32_0 = arith.constant 0 : i32
    %2 = arith.cmpi ne, %1, %c0_i32_0 : i32
    scf.if %2 {
      %cst_37 = arith.constant 0.000000e+00 : f32
      %65 = vector.broadcast %cst_37 : f32 to vector<128x1xf32>
      %c0_38 = arith.constant 0 : index
      %c0_39 = arith.constant 0 : index
      %66 = vector.load %arg11[%c0_38, %c0_39] : memref<128x1xf32, #tpu.memory_space<vmem>>, vector<128x1xf32>
      tpu.vector_store %arg11[%c0_38, %c0_39], %65 {strides = array<i32>} : memref<128x1xf32, #tpu.memory_space<vmem>>, vector<128x1xf32>,
      %cst_40 = arith.constant 0.000000e+00 : f32
      %67 = vector.broadcast %cst_40 : f32 to vector<128x1xf32>
      %c0_41 = arith.constant 0 : index
      %c0_42 = arith.constant 0 : index
      %68 = vector.load %arg12[%c0_41, %c0_42] : memref<128x1xf32, #tpu.memory_space<vmem>>, vector<128x1xf32>
      tpu.vector_store %arg12[%c0_41, %c0_42], %67 {strides = array<i32>} : memref<128x1xf32, #tpu.memory_space<vmem>>, vector<128x1xf32>,
      %cst_43 = arith.constant 0.000000e+00 : f32
      %69 = vector.broadcast %cst_43 : f32 to vector<128x1xf32>
      %c0_44 = arith.constant 0 : index
      %c0_45 = arith.constant 0 : index
      %70 = vector.load %arg13[%c0_44, %c0_45] : memref<128x1xf32, #tpu.memory_space<vmem>>, vector<128x1xf32>
      tpu.vector_store %arg13[%c0_44, %c0_45], %69 {strides = array<i32>} : memref<128x1xf32, #tpu.memory_space<vmem>>, vector<128x1xf32>,
    } else {
    }
    %c0 = arith.constant 0 : index
    %c0_1 = arith.constant 0 : index
    %3 = memref.load %arg2[%c0, %c0_1] : memref<1x1xf32, #tpu.memory_space<smem>>
    %c0_2 = arith.constant 0 : index
    %c0_3 = arith.constant 0 : index
    %4 = vector.load %arg3[%c0_2, %c0_3] : memref<128x128xf32, #tpu.memory_space<vmem>>, vector<128x128xf32>
    %c0_4 = arith.constant 0 : index
    %c0_5 = arith.constant 0 : index
    %5 = vector.load %arg4[%c0_4, %c0_5] : memref<128x128xf32, #tpu.memory_space<vmem>>, vector<128x128xf32>
    %cst = arith.constant dense<0.000000e+00> : vector<128x128xf32>
    %6 = tpu.matmul %4, %5, %cst {dimension_numbers = #tpu.dot_dimension_numbers<[1], [0], [0], [1], [0, 0, 1, 1], [], []>} : vector<128x128xf32>, vector<128x128xf32>, vector<128x128xf32> -> vector<128x128xf32>
    %c0_6 = arith.constant 0 : index
    %c0_7 = arith.constant 0 : index
    %7 = vector.load %arg7[%c0_6, %c0_7] : memref<128x1xf32, #tpu.memory_space<vmem>>, vector<128x1xf32>
    %c0_8 = arith.constant 0 : index
    %c0_9 = arith.constant 0 : index
    %8 = vector.load %arg8[%c0_8, %c0_9] : memref<1x128xf32, #tpu.memory_space<vmem>>, vector<1x128xf32>
    %9 = vector.broadcast %7 : vector<128x1xf32> to vector<128x128xf32>
    %10 = vector.broadcast %8 : vector<1x128xf32> to vector<128x128xf32>
    %11 = arith.addf %9, %10 : vector<128x128xf32>
    %cst_10 = arith.constant 2.000000e+00 : f32
    %12 = vector.broadcast %cst_10 : f32 to vector<128x128xf32>
    %13 = arith.mulf %12, %6 : vector<128x128xf32>
    %14 = arith.subf %11, %13 : vector<128x128xf32>
    %cst_11 = arith.constant 0.000000e+00 : f32
    %15 = vector.broadcast %cst_11 : f32 to vector<128x128xf32>
    %16 = arith.maximumf %14, %15 : vector<128x128xf32>
    %17 = math.sqrt %16 : vector<128x128xf32>
    %cst_12 = arith.constant 0.000000e+00 : f32
    %18 = vector.broadcast %cst_12 : f32 to vector<128x128xf32>
    %19 = arith.subf %18, %17 : vector<128x128xf32>
    %20 = vector.broadcast %3 : f32 to vector<128x128xf32>
    %21 = arith.mulf %19, %20 : vector<128x128xf32>
    %22 = math.exp %21 : vector<128x128xf32>
    %c128_i32 = arith.constant 128 : i32
    %23 = arith.muli %arg0, %c128_i32 : i32
    %24 = tpu.iota {dimensions = array<i32: 0>} : vector<128x128xi32>
    %25 = vector.broadcast %23 : i32 to vector<128x128xi32>
    %26 = arith.addi %25, %24 : vector<128x128xi32>
    %c128_i32_13 = arith.constant 128 : i32
    %27 = arith.muli %arg1, %c128_i32_13 : i32
    %28 = tpu.iota {dimensions = array<i32: 1>} : vector<128x128xi32>
    %29 = vector.broadcast %27 : i32 to vector<128x128xi32>
    %30 = arith.addi %29, %28 : vector<128x128xi32>
    %c8_i32 = arith.constant 8 : i32
    %31 = vector.broadcast %c8_i32 : i32 to vector<128x128xi32>
    %32 = arith.cmpi slt, %30, %31 : vector<128x128xi32>
    %33 = arith.cmpi ne, %26, %30 : vector<128x128xi32>
    %34 = arith.andi %32, %33 : vector<128x128xi1>
    %c0_14 = arith.constant 0 : index
    %c0_15 = arith.constant 0 : index
    %35 = vector.load %arg5[%c0_14, %c0_15] : memref<128x1xi32, #tpu.memory_space<vmem>>, vector<128x1xi32>
    %c0_16 = arith.constant 0 : index
    %c0_17 = arith.constant 0 : index
    %36 = vector.load %arg6[%c0_16, %c0_17] : memref<1x128xi32, #tpu.memory_space<vmem>>, vector<1x128xi32>
    %37 = vector.broadcast %35 : vector<128x1xi32> to vector<128x128xi32>
    %38 = vector.broadcast %36 : vector<1x128xi32> to vector<128x128xi32>
    %39 = arith.cmpi eq, %37, %38 : vector<128x128xi32>
    %40 = arith.andi %39, %34 : vector<128x128xi1>
    %cst_18 = arith.constant 0.000000e+00 : f32
    %41 = vector.broadcast %cst_18 : f32 to vector<128x128xf32>
    %42 = arith.select %34, %22, %41 : vector<128x128xi1>, vector<128x128xf32>
    %c0_19 = arith.constant 0 : index
    %c0_20 = arith.constant 0 : index
    %43 = vector.load %arg11[%c0_19, %c0_20] : memref<128x1xf32, #tpu.memory_space<vmem>>, vector<128x1xf32>
    %cst_21 = arith.constant 0.000000e+00 : f32
    %44 = vector.broadcast %cst_21 : f32 to vector<128x128xf32>
    %45 = arith.select %40, %42, %44 : vector<128x128xi1>, vector<128x128xf32>
    %cst_22 = arith.constant dense<0.000000e+00> : vector<128xf32>
    %46 = vector.multi_reduction <add>, %45, %cst_22 [1] : vector<128x128xf32> to vector<128xf32>
    %47 = vector.shape_cast %46 : vector<128xf32> to vector<128x1xf32>
    %48 = arith.addf %43, %47 : vector<128x1xf32>
    %c0_23 = arith.constant 0 : index
    %c0_24 = arith.constant 0 : index
    %49 = vector.load %arg11[%c0_23, %c0_24] : memref<128x1xf32, #tpu.memory_space<vmem>>, vector<128x1xf32>
    tpu.vector_store %arg11[%c0_23, %c0_24], %48 {strides = array<i32>} : memref<128x1xf32, #tpu.memory_space<vmem>>, vector<128x1xf32>,
    %c0_25 = arith.constant 0 : index
    %c0_26 = arith.constant 0 : index
    %50 = vector.load %arg12[%c0_25, %c0_26] : memref<128x1xf32, #tpu.memory_space<vmem>>, vector<128x1xf32>
    %cst_27 = arith.constant dense<0.000000e+00> : vector<128xf32>
    %51 = vector.multi_reduction <add>, %42, %cst_27 [1] : vector<128x128xf32> to vector<128xf32>
    %52 = vector.shape_cast %51 : vector<128xf32> to vector<128x1xf32>
    %53 = arith.addf %50, %52 : vector<128x1xf32>
    %c0_28 = arith.constant 0 : index
    %c0_29 = arith.constant 0 : index
    %54 = vector.load %arg12[%c0_28, %c0_29] : memref<128x1xf32, #tpu.memory_space<vmem>>, vector<128x1xf32>
    tpu.vector_store %arg12[%c0_28, %c0_29], %53 {strides = array<i32>} : memref<128x1xf32, #tpu.memory_space<vmem>>, vector<128x1xf32>,
    %c0_30 = arith.constant 0 : index
    %c0_31 = arith.constant 0 : index
    %55 = vector.load %arg13[%c0_30, %c0_31] : memref<128x1xf32, #tpu.memory_space<vmem>>, vector<128x1xf32>
    %56 = arith.extui %40 : vector<128x128xi1> to vector<128x128xi32>
    %57 = arith.sitofp %56 : vector<128x128xi32> to vector<128x128xf32>
    %cst_32 = arith.constant dense<0.000000e+00> : vector<128xf32>
    %58 = vector.multi_reduction <add>, %57, %cst_32 [1] : vector<128x128xf32> to vector<128xf32>
    %59 = vector.shape_cast %58 : vector<128xf32> to vector<128x1xf32>
    %60 = arith.addf %55, %59 : vector<128x1xf32>
    %c0_33 = arith.constant 0 : index
    %c0_34 = arith.constant 0 : index
    %61 = vector.load %arg13[%c0_33, %c0_34] : memref<128x1xf32, #tpu.memory_space<vmem>>, vector<128x1xf32>
    tpu.vector_store %arg13[%c0_33, %c0_34], %60 {strides = array<i32>} : memref<128x1xf32, #tpu.memory_space<vmem>>, vector<128x1xf32>,
    %c0_i32_35 = arith.constant 0 : i32
    %62 = arith.cmpi eq, %arg1, %c0_i32_35 : i32
    %63 = arith.extui %62 : i1 to i32
    %c0_i32_36 = arith.constant 0 : i32
    %64 = arith.cmpi ne, %63, %c0_i32_36 : i32
    scf.if %64 {
      %c0_37 = arith.constant 0 : index
      %c0_38 = arith.constant 0 : index
      %65 = vector.load %arg13[%c0_37, %c0_38] : memref<128x1xf32, #tpu.memory_space<vmem>>, vector<128x1xf32>
      %cst_39 = arith.constant 0.000000e+00 : f32
      %66 = vector.broadcast %cst_39 : f32 to vector<128x1xf32>
      %67 = arith.cmpf ogt, %65, %66 : vector<128x1xf32>
      %c0_40 = arith.constant 0 : index
      %c0_41 = arith.constant 0 : index
      %68 = vector.load %arg11[%c0_40, %c0_41] : memref<128x1xf32, #tpu.memory_space<vmem>>, vector<128x1xf32>
      %69 = math.log %68 : vector<128x1xf32>
      %c0_42 = arith.constant 0 : index
      %c0_43 = arith.constant 0 : index
      %70 = vector.load %arg12[%c0_42, %c0_43] : memref<128x1xf32, #tpu.memory_space<vmem>>, vector<128x1xf32>
      %cst_44 = arith.constant 9.99999993E-9 : f32
      %71 = vector.broadcast %cst_44 : f32 to vector<128x1xf32>
      %72 = arith.addf %70, %71 : vector<128x1xf32>
      %73 = math.log %72 : vector<128x1xf32>
      %74 = arith.subf %69, %73 : vector<128x1xf32>
      %cst_45 = arith.constant 0.000000e+00 : f32
      %75 = vector.broadcast %cst_45 : f32 to vector<128x1xf32>
      %76 = arith.select %67, %74, %75 : vector<128x1xi1>, vector<128x1xf32>
      %c0_46 = arith.constant 0 : index
      %c0_47 = arith.constant 0 : index
      %77 = vector.load %arg9[%c0_46, %c0_47] : memref<128x1xf32, #tpu.memory_space<vmem>>, vector<128x1xf32>
      tpu.vector_store %arg9[%c0_46, %c0_47], %76 {strides = array<i32>} : memref<128x1xf32, #tpu.memory_space<vmem>>, vector<128x1xf32>,
      %78 = arith.extui %67 : vector<128x1xi1> to vector<128x1xi32>
      %79 = arith.sitofp %78 : vector<128x1xi32> to vector<128x1xf32>
      %c0_48 = arith.constant 0 : index
      %c0_49 = arith.constant 0 : index
      %80 = vector.load %arg10[%c0_48, %c0_49] : memref<128x1xf32, #tpu.memory_space<vmem>>, vector<128x1xf32>
      tpu.vector_store %arg10[%c0_48, %c0_49], %79 {strides = array<i32>} : memref<128x1xf32, #tpu.memory_space<vmem>>, vector<128x1xf32>,
    } else {
    }
    return
  }
  func.func @transform_0(%arg0: i32, %arg1: i32) -> (i32, i32) {
    %c0_i32 = arith.constant 0 : i32
    %c0_i32_0 = arith.constant 0 : i32
    %c0_i32_1 = arith.constant 0 : i32
    return %c0_i32, %c0_i32_0 : i32, i32
  }
  func.func @transform_1(%arg0: i32, %arg1: i32) -> (i32, i32) {
    %c0_i32 = arith.constant 0 : i32
    %c0_i32_0 = arith.constant 0 : i32
    return %arg0, %c0_i32 : i32, i32
  }
  func.func @transform_2(%arg0: i32, %arg1: i32) -> (i32, i32) {
    %c0_i32 = arith.constant 0 : i32
    %c0_i32_0 = arith.constant 0 : i32
    return %c0_i32, %arg1 : i32, i32
  }
  func.func @transform_3(%arg0: i32, %arg1: i32) -> (i32, i32) {
    %c0_i32 = arith.constant 0 : i32
    %c0_i32_0 = arith.constant 0 : i32
    return %arg0, %c0_i32 : i32, i32
  }
  func.func @transform_4(%arg0: i32, %arg1: i32) -> (i32, i32) {
    %c0_i32 = arith.constant 0 : i32
    %c0_i32_0 = arith.constant 0 : i32
    return %c0_i32, %arg1 : i32, i32
  }
  func.func @transform_5(%arg0: i32, %arg1: i32) -> (i32, i32) {
    %c0_i32 = arith.constant 0 : i32
    %c0_i32_0 = arith.constant 0 : i32
    return %arg0, %c0_i32 : i32, i32
  }
  func.func @transform_6(%arg0: i32, %arg1: i32) -> (i32, i32) {
    %c0_i32 = arith.constant 0 : i32
    %c0_i32_0 = arith.constant 0 : i32
    return %c0_i32, %arg1 : i32, i32
  }
  func.func @transform_7(%arg0: i32, %arg1: i32) -> (i32, i32) {
    %c0_i32 = arith.constant 0 : i32
    %c0_i32_0 = arith.constant 0 : i32
    return %arg0, %c0_i32 : i32, i32
  }
  func.func @transform_8(%arg0: i32, %arg1: i32) -> (i32, i32) {
    %c0_i32 = arith.constant 0 : i32
    %c0_i32_0 = arith.constant 0 : i32
    return %arg0, %c0_i32 : i32, i32
  }
}

</mosaic_0001>

<bundles_post_ra>
// kernel: tpu_custom_call.1
= control target key start
LH: loop header
LB: loop body
LE: loop exit
PB: predicated region body
PF: predicated region fallthrough
CT: control target
= control target key end

     0   :  { %v1620_v2 = vmov 0   ;;  %s2846_s2 = inlined_call_operand.vmem [shape: f32[128,128], index: 2, kind: input, shape index: {}]   ;;  %s2847_s1 = inlined_call_operand.vmem [shape: f32[128,128], index: 1, kind: input, shape index: {}]   ;;  %s2848_s5 = inlined_call_operand.vmem [shape: f32[128,1], index: 5, kind: input, shape index: {}]   ;;  %s2849_s3 = inlined_call_operand.vmem [shape: s32[128,1], index: 3, kind: input, shape index: {}]   ;;  %s2850_s4 = inlined_call_operand.vmem [shape: s32[1,128], index: 4, kind: input, shape index: {}]   ;;  %s2851_s6 = inlined_call_operand.vmem [shape: f32[1,128], index: 6, kind: input, shape index: {}]   ;;  %s2852_s0 = inlined_call_operand.<no memory space> [shape: f32[1,1], index: 0, kind: input, shape index: {}]   ;;  %s2853_s8 = inlined_call_operand.vmem [shape: f32[128,1], index: 8, kind: output, shape index: {1}]   ;;  %s2854_s7 = inlined_call_operand.vmem [shape: f32[128,1], index: 7, kind: output, shape index: {0}]  }
   0x1   :  { %v114_v0 = vld [vmem:[%s2846_s2 + $0x78] sm:$0xff]  ;;  %v113_v1 = vld [vmem:[%s2846_s2 + $0x70] sm:$0xff]  ;;  %1491 = vset.pattern.permute.xlu1 %v1620_v2  ;;  %1490 = vset.pattern.permute.xlu0 %v1620_v2  ;;  %v112_v3 = vld [vmem:[%s2846_s2 + $0x68] sm:$0xff] }
   0x2   :  { %1400 = vmatprep.subr.mxu0 %v114_v0  ;;  %1456 = vmatprep.subr.mxu1 %v114_v0  ;;  %v111_v4 = vld [vmem:[%s2846_s2 + $0x60] sm:$0xff]  ;;  %v110_v5 = vld [vmem:[%s2846_s2 + $0x58] sm:$0xff]  ;;  %v109_v6 = vld [vmem:[%s2846_s2 + $0x50] sm:$0xff] }
   0x3   :  { %1401 = vmatpush3.msra.mxu0 %v114_v0  ;;  %1472 = vmatpush3.msra.mxu1 %v114_v0  ;;  %v108_v7 = vld [vmem:[%s2846_s2 + $0x48] sm:$0xff]  ;;  %v107_v8 = vld [vmem:[%s2846_s2 + $0x40] sm:$0xff]  ;;  %v106_v9 = vld [vmem:[%s2846_s2 + $0x38] sm:$0xff] }
   0x4   :  { %1402 = vmatprep.subr.mxu0 %v113_v1  ;;  %1457 = vmatprep.subr.mxu1 %v113_v1  ;;  %v105_v10 = vld [vmem:[%s2846_s2 + $0x30] sm:$0xff]  ;;  %v104_v11 = vld [vmem:[%s2846_s2 + $0x28] sm:$0xff]  ;;  %v103_v12 = vld [vmem:[%s2846_s2 + $0x20] sm:$0xff] }
   0x5   :  { %1403 = vmatpush3.msra.mxu0 %v113_v1  ;;  %1473 = vmatpush3.msra.mxu1 %v113_v1  ;;  %v102_v13 = vld [vmem:[%s2846_s2 + $0x18] sm:$0xff]  ;;  %v101_v14 = vld [vmem:[%s2846_s2 + $0x10] sm:$0xff]  ;;  %v100_v15 = vld [vmem:[%s2846_s2 + $0x8] sm:$0xff]  ;;  %v605_v1 = vlaneseq }
   0x6   :  { %1404 = vmatprep.subr.mxu0 %v112_v3  ;;  %1458 = vmatprep.subr.mxu1 %v112_v3  ;;  %v99_v16 = vld [vmem:[%s2846_s2] sm:$0xff]  ;;  %v262_v19 = vld [vmem:[%s2848_s5 + $0x10] sm:$0xff]  ;;  %v84_v20 = vld [vmem:[%s2847_s1 + $0x8] sm:$0xff] }
   0x7   :  { %1405 = vmatpush3.msra.mxu0 %v112_v3  ;;  %1474 = vmatpush3.msra.mxu1 %v112_v3  ;;  %v83_v17 = vld [vmem:[%s2847_s1] sm:$0xff]  ;;  %v92_v21 = vld [vmem:[%s2847_s1 + $0x48] sm:$0xff]  ;;  %v85_v22 = vld [vmem:[%s2847_s1 + $0x10] sm:$0xff]  ;;  %v1859_v2 = vshrl.u32 %v605_v1, 7  ;;  %v1861_v3 = vand.u32 127, %v605_v1  ;;  %v2929_v1 = vmov 0 }
   0x8   :  { %1406 = vmatprep.subr.mxu0 %v111_v4  ;;  %1459 = vmatprep.subr.mxu1 %v111_v4  ;;  %v91_v18 = vld [vmem:[%s2847_s1 + $0x40] sm:$0xff]  ;;  %v93_v23 = vld [vmem:[%s2847_s1 + $0x50] sm:$0xff]  ;;  %v263_v25 = vld [vmem:[%s2848_s5 + $0x18] sm:$0xff] }
   0x9   :  { %1407 = vmatpush3.msra.mxu0 %v111_v4  ;;  %1475 = vmatpush3.msra.mxu1 %v111_v4  ;;  %v260_v24 = vld [vmem:[%s2848_s5] sm:$0xff]  ;;  %v86_v26 = vld [vmem:[%s2847_s1 + $0x18] sm:$0xff]  ;;  %v261_v30 = vld [vmem:[%s2848_s5 + $0x8] sm:$0xff]  ;;  %v615_v4 = vadd.s32 72, %v1859_v2  ;;  %vm644_vm0 = vcmp.lt.s32.totalorder %v1861_v3, 8 }
   0xa   :  { %1408 = vmatprep.subr.mxu0 %v110_v5  ;;  %1460 = vmatprep.subr.mxu1 %v110_v5  ;;  %v94_v27 = vld [vmem:[%s2847_s1 + $0x58] sm:$0xff]  ;;  %v87_v28 = vld [vmem:[%s2847_s1 + $0x20] sm:$0xff]  ;;  %v265_v31 = vld [vmem:[%s2848_s5 + $0x28] sm:$0xff] }
   0xb   :  { %1409 = vmatpush3.msra.mxu0 %v110_v5  ;;  %1476 = vmatpush3.msra.mxu1 %v110_v5  ;;  %v95_v29 = vld [vmem:[%s2847_s1 + $0x60] sm:$0xff]  ;;  %v88_v32 = vld [vmem:[%s2847_s1 + $0x28] sm:$0xff]  ;;  %v89_v34 = vld [vmem:[%s2847_s1 + $0x30] sm:$0xff]  ;;  %vm654_vm1 = vcmp.ne.s32.totalorder %v615_v4, %v1861_v3  ;;  %v2932_v4 = vmov 0 }
   0xc   :  { %1410 = vmatprep.subr.mxu0 %v109_v6  ;;  %1461 = vmatprep.subr.mxu1 %v109_v6  ;;  %v96_v33 = vld [vmem:[%s2847_s1 + $0x68] sm:$0xff]  ;;  %v97_v35 = vld [vmem:[%s2847_s1 + $0x70] sm:$0xff]  ;;  %v264_v36 = vld [vmem:[%s2848_s5 + $0x20] sm:$0xff] }
   0xd   :  { %1411 = vmatpush3.msra.mxu0 %v109_v6  ;;  %1477 = vmatpush3.msra.mxu1 %v109_v6  ;;  %v267_v37 = vld [vmem:[%s2848_s5 + $0x38] sm:$0xff]  ;;  %v266_v40 = vld [vmem:[%s2848_s5 + $0x30] sm:$0xff]  ;;  %v269_v41 = vld [vmem:[%s2848_s5 + $0x48] sm:$0xff]  ;;  %v617_v6 = vadd.s32 88, %v1859_v2 }
   0xe   :  { %1412 = vmatprep.subr.mxu0 %v108_v7  ;;  %1462 = vmatprep.subr.mxu1 %v108_v7  ;;  %v90_v38 = vld [vmem:[%s2847_s1 + $0x38] sm:$0xff]  ;;  %v268_v42 = vld [vmem:[%s2848_s5 + $0x40] sm:$0xff]  ;;  %v270_v44 = vld [vmem:[%s2848_s5 + $0x50] sm:$0xff] }
   0xf   :  { %1413 = vmatpush3.msra.mxu0 %v108_v7  ;;  %1478 = vmatpush3.msra.mxu1 %v108_v7  ;;  %v98_v39 = vld [vmem:[%s2847_s1 + $0x78] sm:$0xff]  ;;  %v273_v45 = vld [vmem:[%s2848_s5 + $0x68] sm:$0xff]  ;;  %v272_v46 = vld [vmem:[%s2848_s5 + $0x60] sm:$0xff]  ;;  %vm656_vm3 = vcmp.ne.s32.totalorder %v617_v6, %v1861_v3 }
  0x10   :  { %1414 = vmatprep.subr.mxu0 %v107_v8  ;;  %1463 = vmatprep.subr.mxu1 %v107_v8  ;;  %v271_v43 = vld [vmem:[%s2848_s5 + $0x58] sm:$0xff]  ;;  %v274_v48 = vld [vmem:[%s2848_s5 + $0x70] sm:$0xff]  ;;  %v678_v49 = vld [vmem:[%s2849_s3 + $0x8] sm:$0xff] }
  0x11   :  { %1415 = vmatpush3.msra.mxu0 %v107_v8  ;;  %1479 = vmatpush3.msra.mxu1 %v107_v8  ;;  %v275_v47 = vld [vmem:[%s2848_s5 + $0x78] sm:$0xff]  ;;  %v677_v50 = vld [vmem:[%s2849_s3] sm:$0xff]  ;;  %v679_v52 = vld [vmem:[%s2849_s3 + $0x10] sm:$0xff]  ;;  %v619_v8 = vadd.s32 104, %v1859_v2 }
  0x12   :  { %1416 = vmatprep.subr.mxu0 %v106_v9  ;;  %1464 = vmatprep.subr.mxu1 %v106_v9  ;;  %v680_v51 = vld [vmem:[%s2849_s3 + $0x18] sm:$0xff]  ;;  %v682_v53 = vld [vmem:[%s2849_s3 + $0x28] sm:$0xff]  ;;  %v681_v54 = vld [vmem:[%s2849_s3 + $0x20] sm:$0xff] }
  0x13   :  { %1417 = vmatpush3.msra.mxu0 %v106_v9  ;;  %1480 = vmatpush3.msra.mxu1 %v106_v9  ;;  %v684_v55 = vld [vmem:[%s2849_s3 + $0x38] sm:$0xff]  ;;  %v683_v56 = vld [vmem:[%s2849_s3 + $0x30] sm:$0xff]  ;;  %v686_v57 = vld [vmem:[%s2849_s3 + $0x48] sm:$0xff]  ;;  %v614_v9 = vadd.s32 64, %v1859_v2  ;;  %vm658_vm5 = vcmp.ne.s32.totalorder %v619_v8, %v1861_v3 }
  0x14   :  { %1418 = vmatprep.subr.mxu0 %v105_v10  ;;  %1465 = vmatprep.subr.mxu1 %v105_v10  ;;  %v685_v58 = vld [vmem:[%s2849_s3 + $0x40] sm:$0xff]  ;;  %v688_v59 = vld [vmem:[%s2849_s3 + $0x58] sm:$0xff]  ;;  %v687_v60 = vld [vmem:[%s2849_s3 + $0x50] sm:$0xff] }
  0x15   :  { %1419 = vmatpush3.msra.mxu0 %v105_v10  ;;  %1481 = vmatpush3.msra.mxu1 %v105_v10  ;;  %v690_v61 = vld [vmem:[%s2849_s3 + $0x68] sm:$0xff]  ;;  %v689_v62 = vld [vmem:[%s2849_s3 + $0x60] sm:$0xff]  ;;  %v692_v63 = vld [vmem:[%s2849_s3 + $0x78] sm:$0xff]  ;;  %vm653_vm6 = vcmp.ne.s32.totalorder %v614_v9, %v1861_v3  ;;  %v616_v10 = vadd.s32 80, %v1859_v2 }
  0x16   :  { %1420 = vmatprep.subr.mxu0 %v104_v11  ;;  %1466 = vmatprep.subr.mxu1 %v104_v11  ;;  %v691_v0 = vld [vmem:[%s2849_s3 + $0x70] sm:$0xff]  ;;  %vm1868_vm2 = vmand %vm644_vm0, %vm654_vm1 }
  0x17   :  { %1421 = vmatpush3.msra.mxu0 %v104_v11  ;;  %1482 = vmatpush3.msra.mxu1 %v104_v11  ;;  %vm1876_vm4 = vmand %vm644_vm0, %vm656_vm3  ;;  %v2894_v11 = vmov 0  ;;  %vm655_vm9 = vcmp.ne.s32.totalorder %v616_v10, %v1861_v3 }
  0x18   :  { %1422 = vmatprep.subr.mxu0 %v103_v12  ;;  %1467 = vmatprep.subr.mxu1 %v103_v12  ;;  %vm1887_vm7 = vmand %vm644_vm0, %vm658_vm5 }
  0x19   :  { %1423 = vmatpush3.msra.mxu0 %v103_v12  ;;  %1483 = vmatpush3.msra.mxu1 %v103_v12  ;;  %v2895_v11 = vsel %vm1887_vm7, 4294967295, %v2894_v11  ;;  %vm1893_vm8 = vmand %vm644_vm0, %vm653_vm6 }
  0x1a   :  { %1424 = vmatprep.subr.mxu0 %v102_v13  ;;  %1468 = vmatprep.subr.mxu1 %v102_v13  ;;  %vm1901_vm10 = vmand %vm644_vm0, %vm655_vm9 }
  0x1b   :  { %1425 = vmatpush3.msra.mxu0 %v102_v13  ;;  %1484 = vmatpush3.msra.mxu1 %v102_v13  ;;  %v613_v13 = vadd.s32 56, %v1859_v2 }
  0x1c   :  { %1426 = vmatprep.subr.mxu0 %v101_v14  ;;  %1469 = vmatprep.subr.mxu1 %v101_v14 }
  0x1d   :  { %1427 = vmatpush3.msra.mxu0 %v101_v14  ;;  %1485 = vmatpush3.msra.mxu1 %v101_v14  ;;  %v2898_v14 = vmov 0  ;;  %vm652_vm11 = vcmp.ne.s32.totalorder %v613_v13, %v1861_v3  ;;  %v2938_v13 = vmov 0 }
  0x1e   :  { %1428 = vmatprep.subr.mxu0 %v100_v15  ;;  %1470 = vmatprep.subr.mxu1 %v100_v15  ;;  %v2899_v14 = vsel %vm1901_vm10, 4294967295, %v2898_v14  ;;  %vm1909_vm12 = vmand %vm644_vm0, %vm652_vm11 }
  0x1f   :  { %1429 = vmatpush3.msra.mxu0 %v100_v15  ;;  %1486 = vmatpush3.msra.mxu1 %v100_v15  ;;  %v621_v15 = vadd.s32 120, %v1859_v2 }
  0x20   :  { %1430 = vmatprep.subr.mxu0 %v99_v16  ;;  %1471 = vmatprep.subr.mxu1 %v99_v16 }
  0x21   :  { %1431 = vmatpush3.msra.mxu0 %v99_v16  ;;  %1487 = vmatpush3.msra.mxu1 %v99_v16  ;;  %v2900_v16 = vmov 0  ;;  %vm660_vm13 = vcmp.ne.s32.totalorder %v621_v15, %v1861_v3 }
  0x22   :  { %1432 = vmatprep.mubr.f32.mxu0 %v83_v17  ;;  %1444 = vmatprep.mubr.f32.mxu1 %v91_v18  ;;  %v2901_v16 = vsel %vm1909_vm12, 4294967295, %v2900_v16  ;;  %v618_v17 = vadd.s32 96, %v1859_v2  ;;  %vm1917_vm14 = vmand %vm644_vm0, %vm660_vm13  ;;  %v2902_v18 = vmov 0  ;;  %vm645_vm13 = vcmp.ne.s32.totalorder %v1859_v2, %v1861_v3 }
  0x23   :  { %289 = vperm.xlu1 %1491, %v262_v19   ;;  %1433 = vmatmul.mubr.f32.vlgmr.msra.gmra.mxu0 %v84_v20  ;;  %v2903_v18 = vsel %vm1917_vm14, 4294967295, %v2902_v18  ;;  %v612_v19 = vadd.s32 48, %v1859_v2  ;;  %v620_v20 = vadd.s32 112, %v1859_v2 }
  0x24   :  { %1445 = vmatmul.mubr.f32.vlgmr.msra.gmra.mxu1 %v92_v21  ;;  %1435 = vmatprep.mubr.f32.mxu0 %v85_v22  ;;  %vm657_vm15 = vcmp.ne.s32.totalorder %v618_v17, %v1861_v3  ;;  %v2904_v21 = vmov 0  ;;  %v2906_v22 = vmov 0  ;;  %v2940_v17 = vmov 0 }
  0x25   :  { %1447 = vmatprep.mubr.f32.mxu1 %v93_v23  ;;  %279 = vperm.xlu0 %1490, %v260_v24   ;;  %vm1926_vm1 = vmand %vm644_vm0, %vm657_vm15  ;;  %vm651_vm3 = vcmp.ne.s32.totalorder %v612_v19, %v1861_v3  ;;  %vm659_vm5 = vcmp.ne.s32.totalorder %v620_v20, %v1861_v3  ;;  %v2908_v23 = vmov 0 }
  0x26   :  { %v2905_v21 = vsel %vm1926_vm1, 4294967295, %v2904_v21  ;;  %vm1934_vm6 = vmand %vm644_vm0, %vm651_vm3 }
  0x27   :  { %294 = vperm.xlu1 %1491, %v263_v25   ;;  %1436 = vmatmul.mubr.f32.gmra.mxu0 %v86_v26  ;;  %v2907_v22 = vsel %vm1934_vm6, 4294967295, %v2906_v22  ;;  %vm1940_vm9 = vmand %vm644_vm0, %vm659_vm5 }
  0x28   :  { %1448 = vmatmul.mubr.f32.gmra.mxu1 %v94_v27  ;;  %1438 = vmatprep.mubr.f32.mxu0 %v87_v28  ;;  %v2909_v23 = vsel %vm1940_vm9, 4294967295, %v2908_v23  ;;  %vm1998_vm9 = vmand %vm644_vm0, %vm645_vm13 }
  0x29   :  { %1450 = vmatprep.mubr.f32.mxu1 %v95_v29  ;;  %284 = vperm.xlu0 %1490, %v261_v30   ;;  %2910 = vst [vmem:[#allocation6_spill] sm:$0xff] %v2909_v23 }
  0x2b   :  { %304 = vperm.xlu1 %1491, %v265_v31   ;;  %1439 = vmatmul.mubr.f32.gmra.mxu0 %v88_v32 }
  0x2c   :  { %1451 = vmatmul.mubr.f32.gmra.mxu1 %v96_v33  ;;  %1441 = vmatprep.mubr.f32.mxu0 %v89_v34 }
  0x2d   :  { %1453 = vmatprep.mubr.f32.mxu1 %v97_v35  ;;  %299 = vperm.xlu0 %1490, %v264_v36  }
  0x2f   :  { %314 = vperm.xlu1 %1491, %v267_v37   ;;  %1442 = vmatmul.mubr.f32.gmra.mxu0 %v90_v38  ;;  %v607_v37 = vadd.s32 8, %v1859_v2 }
  0x30   :  { %1454 = vmatmul.mubr.f32.gmra.mxu1 %v98_v39 }
  0x31   :  { %309 = vperm.xlu0 %1490, %v266_v40   ;;  %vm646_vm11 = vcmp.ne.s32.totalorder %v607_v37, %v1861_v3  ;;  %v609_v40 = vadd.s32 24, %v1859_v2 }
  0x32   :  { %vm1989_vm15 = vmand %vm644_vm0, %vm646_vm11 }
  0x33   :  { %324 = vperm.xlu1 %1491, %v269_v41   ;;  %v1980_v41 = vld [vmem:[%s2850_s4] ss:$0 sm:$0xff]  ;;  %vm648_vm3 = vcmp.ne.s32.totalorder %v609_v40, %v1861_v3 }
  0x34   :  { %vm2016_vm13 = vmand %vm644_vm0, %vm648_vm3 }
  0x35   :  { %319 = vperm.xlu0 %1490, %v268_v42  }
  0x37   :  { %334 = vperm.xlu1 %1491, %v271_v43   ;;  %v608_v43 = vadd.s32 16, %v1859_v2 }
  0x39   :  { %329 = vperm.xlu0 %1490, %v270_v44   ;;  %v2911_v44 = vmov 0  ;;  %vm647_vm14 = vcmp.ne.s32.totalorder %v608_v43, %v1861_v3 }
  0x3a   :  { %v2912_v44 = vsel %vm1989_vm15, 4294967295, %v2911_v44  ;;  %vm2033_vm3 = vmand %vm644_vm0, %vm647_vm14 }
  0x3b   :  { %344 = vperm.xlu1 %1491, %v273_v45  }
  0x3d   :  { %339 = vperm.xlu0 %1490, %v272_v46   ;;  %v611_v46 = vadd.s32 40, %v1859_v2 }
  0x3f   :  { %354 = vperm.xlu1 %1491, %v275_v47   ;;  %v2913_v47 = vmov 0 }
  0x40   :  { %v2914_v47 = vsel %vm1998_vm9, 4294967295, %v2913_v47 }
  0x41   :  { %349 = vperm.xlu0 %1490, %v274_v48  }
  0x43   :  { %698 = vperm.xlu1 %1491, %v678_v49   ;;  %v2915_v49 = vmov 0 }
  0x45   :  { %695 = vperm.xlu0 %1490, %v677_v50   ;;  %v610_v50 = vadd.s32 32, %v1859_v2 }
  0x47   :  { %704 = vperm.xlu1 %1491, %v680_v51   ;;  %v2878_v51 = vmov 0.0  }
  0x49   :  { %701 = vperm.xlu0 %1490, %v679_v52  }
  0x4b   :  { %710 = vperm.xlu1 %1491, %v682_v53  }
  0x4d   :  { %707 = vperm.xlu0 %1490, %v681_v54  }
  0x4f   :  { %716 = vperm.xlu1 %1491, %v684_v55   ;;  %v2919_v55 = vmov 0 }
  0x51   :  { %713 = vperm.xlu0 %1490, %v683_v56  }
  0x53   :  { %722 = vperm.xlu1 %1491, %v686_v57   ;;  %v2921_v57 = vmov 0 }
  0x54   :  { %v2922_v57 = vsel %vm2033_vm3, 4294967295, %v2921_v57 }
  0x55   :  { %719 = vperm.xlu0 %1490, %v685_v58  }
  0x57   :  { %728 = vperm.xlu1 %1491, %v688_v59   ;;  %v2923_v59 = vmov 0 }
  0x59   :  { %725 = vperm.xlu0 %1490, %v687_v60  }
  0x5b   :  { %734 = vperm.xlu1 %1491, %v690_v61   ;;  %v2925_v61 = vmov 0 }
  0x5d   :  { %731 = vperm.xlu0 %1490, %v689_v62  }
  0x5f   :  { %740 = vperm.xlu1 %1491, %v692_v63   ;;  %v2927_v63 = vmov 0 }
  0x61   :  { %737 = vperm.xlu0 %1490, %v691_v0  }
  0x9e   :  { %v1944_v24 = vpop.permute.xlu1 %289 }
  0xa0   :  { %v1946_v25 = vpop.permute.xlu0 %279 }
  0xa2   :  { %v1948_v26 = vpop.permute.xlu1 %294 }
  0xa4   :  { %v1950_v27 = vpop.permute.xlu0 %284 }
  0xa6   :  { %v1952_v28 = vpop.permute.xlu1 %304 }
  0xa8   :  { %v1954_v29 = vpop.permute.xlu0 %299 }
  0xaa   :  { %v1956_v30 = vpop.permute.xlu1 %314 }
  0xac   :  { %v1958_v31 = vpop.permute.xlu0 %309 }
  0xae   :  { %v1960_v32 = vpop.permute.xlu1 %324 }
  0xb0   :  { %v1962_v33 = vpop.permute.xlu0 %319 }
  0xb2   :  { %v1964_v34 = vpop.permute.xlu1 %334 }
  0xb4   :  { %v1966_v35 = vpop.permute.xlu0 %329 }
  0xb6   :  { %v1968_v36 = vpop.permute.xlu1 %344 }
  0xb8   :  { %v1971_v38 = vpop.permute.xlu0 %339 }
  0xba   :  { %v1973_v39 = vpop.permute.xlu1 %354 }
  0xbc   :  { %v1982_v42 = vpop.permute.xlu0 %349 }
  0xbe   :  { %v699_v45 = vpop.permute.xlu1 %698 }
  0xbf   :  { %vm747_vm5 = vcmp.eq.s32.totalorder %v699_v45, %v1980_v41 }
  0xc0   :  { %v696_v48 = vpop.permute.xlu0 %695  ;;  %vm2004_vm11 = vmand %vm747_vm5, %vm1989_vm15  ;;  %vm650_vm15 = vcmp.ne.s32.totalorder %v611_v46, %v1861_v3 }
  0xc1   :  { %v2916_v49 = vsel %vm2004_vm11, 4294967295, %v2915_v49  ;;  %vm746_vm1 = vcmp.eq.s32.totalorder %v696_v48, %v1980_v41  ;;  %v1337_v52 = vsel %vm2004_vm11, 1.0, %v2878_v51  ;;  %vm649_vm11 = vcmp.ne.s32.totalorder %v610_v50, %v1861_v3  ;;  %vm2050_vm14 = vmand %vm644_vm0, %vm650_vm15 }
  0xc2   :  { %v705_v54 = vpop.permute.xlu1 %704  ;;  %1021 = vadd.xlane.f32.xlu0 %v1337_v52  ;;  %vm2022_vm5 = vmand %vm746_vm1, %vm1998_vm9  ;;  %v2926_v61 = vsel %vm2050_vm14, 4294967295, %v2925_v61  ;;  %v2935_v3 = vmov 0  ;;  %v2949_v48 = vmov 0  ;;  %v2952_v52 = vmov 0 }
  0xc3   :  { %v2920_v55 = vsel %vm2022_vm5, 4294967295, %v2919_v55  ;;  %vm749_vm7 = vcmp.eq.s32.totalorder %v705_v54, %v1980_v41  ;;  %v1336_v56 = vsel %vm2022_vm5, 1.0, %v2878_v51  ;;  %vm2066_vm15 = vmand %vm644_vm0, %vm649_vm11 }
  0xc4   :  { %v702_v58 = vpop.permute.xlu0 %701  ;;  %vm2039_vm1 = vmand %vm749_vm7, %vm2016_vm13  ;;  %1019 = vadd.xlane.f32.xlu1 %v1336_v56  ;;  %v2930_v1 = vsel %vm2066_vm15, 4294967295, %v2929_v1 }
  0xc5   :  { %v2924_v59 = vsel %vm2039_vm1, 4294967295, %v2923_v59  ;;  %vm748_vm9 = vcmp.eq.s32.totalorder %v702_v58, %v1980_v41  ;;  %v1339_v60 = vsel %vm2039_vm1, 1.0, %v2878_v51  ;;  %2931 = vst [vmem:[#allocation7_spill] sm:$0xff] %v2930_v1 }
  0xc6   :  { %v711_v62 = vpop.permute.xlu1 %710  ;;  %1025 = vadd.xlane.f32.xlu0 %v1339_v60  ;;  %vm2056_vm7 = vmand %vm748_vm9, %vm2033_vm3  ;;  %v2958_v60 = vmov 0 }
  0xc7   :  { %v2928_v63 = vsel %vm2056_vm7, 4294967295, %v2927_v63  ;;  %vm751_vm5 = vcmp.eq.s32.totalorder %v711_v62, %v1980_v41  ;;  %v1338_v0 = vsel %vm2056_vm7, 1.0, %v2878_v51  ;;  %vm2954_vm7 = vnez %v2905_v21 }
  0xc8   :  { %v708_v2 = vpop.permute.xlu0 %707  ;;  %vm2072_vm1 = vmand %vm751_vm5, %vm2050_vm14  ;;  %1023 = vadd.xlane.f32.xlu1 %v1338_v0  ;;  %v2961_v62 = vmov 0  ;;  %v2162_v0 = vld [vmem:[%s2851_s6] ss:$0 sm:$0xff] }
  0xc9   :  { %v2933_v4 = vsel %vm2072_vm1, 4294967295, %v2932_v4  ;;  %vm750_vm9 = vcmp.eq.s32.totalorder %v708_v2, %v1980_v41  ;;  %v1341_v6 = vsel %vm2072_vm1, 1.0, %v2878_v51 }
  0xca   :  { %2934 = vst [vmem:[#allocation8_spill] sm:$0xff] %v2933_v4  ;;  %v717_v8 = vpop.permute.xlu1 %716  ;;  %1029 = vadd.xlane.f32.xlu0 %v1341_v6  ;;  %vm2082_vm0 = vmand %vm750_vm9, %vm2066_vm15  ;;  %v2166_v6 = vadd.f32 %v2162_v0, %v1950_v27  ;;  %v363_v27 = vadd.f32 %v2162_v0, %v1946_v25 }
  0xcb   :  { %v2936_v3 = vsel %vm2082_vm0, 4294967295, %v2935_v3  ;;  %vm753_vm11 = vcmp.eq.s32.totalorder %v717_v8, %v1980_v41  ;;  %v1340_v9 = vsel %vm2082_vm0, 1.0, %v2878_v51 }
  0xcc   :  { %2937 = vst [vmem:[#allocation9_spill] sm:$0xff] %v2936_v3  ;;  %v714_v10 = vpop.permute.xlu0 %713  ;;  %1027 = vadd.xlane.f32.xlu1 %v1340_v9  ;;  %vm2092_vm5 = vmand %vm753_vm11, %vm1909_vm12 }
  0xcd   :  { %v2939_v13 = vsel %vm2092_vm5, 4294967295, %v2938_v13  ;;  %vm752_vm1 = vcmp.eq.s32.totalorder %v714_v10, %v1980_v41  ;;  %vm2951_vm5 = vnez %v2895_v11 }
  0xce   :  { %v723_v15 = vpop.permute.xlu1 %722  ;;  %vm2099_vm9 = vmand %vm752_vm1, %vm1934_vm6 }
  0xcf   :  { %v2941_v17 = vsel %vm2099_vm9, 4294967295, %v2940_v17  ;;  %vm755_vm15 = vcmp.eq.s32.totalorder %v723_v15, %v1980_v41 }
  0xd0   :  { %2942 = vst [vmem:[#allocation10_spill] sm:$0xff] %v2941_v17  ;;  %v720_v19 = vpop.permute.xlu0 %719  ;;  %vm2106_vm0 = vmand %vm755_vm15, %vm1868_vm2 }
  0xd1   :  { %vm754_vm11 = vcmp.eq.s32.totalorder %v720_v19, %v1980_v41 }
  0xd2   :  { %v729_v37 = vpop.permute.xlu1 %728  ;;  %vm2113_vm14 = vmand %vm754_vm11, %vm1893_vm8 }
  0xd3   :  { %vm757_vm1 = vcmp.eq.s32.totalorder %v729_v37, %v1980_v41 }
  0xd4   :  { %v726_v43 = vpop.permute.xlu0 %725  ;;  %vm2120_vm9 = vmand %vm757_vm1, %vm1876_vm4 }
  0xd5   :  { %vm756_vm15 = vcmp.eq.s32.totalorder %v726_v43, %v1980_v41  ;;  %v371_v43 = vadd.f32 %v2162_v0, %v1962_v33 }
  0xd6   :  { %v735_v46 = vpop.permute.xlu1 %734  ;;  %vm2127_vm6 = vmand %vm756_vm15, %vm1901_vm10 }
  0xd7   :  { %v2950_v48 = vsel %vm2127_vm6, 4294967295, %v2949_v48  ;;  %vm759_vm11 = vcmp.eq.s32.totalorder %v735_v46, %v1980_v41  ;;  %vm2957_vm6 = vnez %v2903_v18 }
  0xd8   :  { %v732_v50 = vpop.permute.xlu0 %731  ;;  %vm2134_vm12 = vmand %vm759_vm11, %vm2951_vm5 }
  0xd9   :  { %v2953_v52 = vsel %vm2134_vm12, 4294967295, %v2952_v52  ;;  %vm758_vm1 = vcmp.eq.s32.totalorder %v732_v50, %v1980_v41  ;;  %vm2960_vm12 = vnez %v2909_v23 }
  0xda   :  { %v741_v54 = vpop.permute.xlu1 %740  ;;  %vm2141_vm3 = vmand %vm758_vm1, %vm2954_vm7  ;;  %vm2882_vm1 = vcmask 7168  }
  0xdb   :  { %vm761_vm15 = vcmp.eq.s32.totalorder %v741_v54, %v1980_v41  ;;  %67 = vst.msk [vmem:[#allocation4 + $0x8] sm:$0xff] %vm2882_vm1, %v2878_v51  ;;  %34 = vst.msk [vmem:[#allocation2] sm:$0xff] %vm2882_vm1, %v2878_v51 }
  0xdc   :  { %v738_v58 = vpop.permute.xlu0 %737  ;;  %vm2148_vm10 = vmand %vm761_vm15, %vm2957_vm6  ;;  %35 = vst.msk [vmem:[#allocation2 + $0x8] sm:$0xff] %vm2882_vm1, %v2878_v51 }
  0xdd   :  { %v2959_v60 = vsel %vm2148_vm10, 4294967295, %v2958_v60  ;;  %vm760_vm11 = vcmp.eq.s32.totalorder %v738_v58, %v1980_v41  ;;  %v2170_v41 = vadd.f32 %v2162_v0, %v1960_v32  ;;  %36 = vst.msk [vmem:[#allocation2 + $0x10] sm:$0xff] %vm2882_vm1, %v2878_v51  ;;  %37 = vst.msk [vmem:[#allocation2 + $0x18] sm:$0xff] %vm2882_vm1, %v2878_v51 }
  0xde   :  { %vm2155_vm5 = vmand %vm760_vm11, %vm2960_vm12  ;;  %38 = vst.msk [vmem:[#allocation2 + $0x20] sm:$0xff] %vm2882_vm1, %v2878_v51 }
  0xdf   :  { %v2962_v62 = vsel %vm2155_vm5, 4294967295, %v2961_v62  ;;  %39 = vst.msk [vmem:[#allocation2 + $0x28] sm:$0xff] %vm2882_vm1, %v2878_v51  ;;  %40 = vst.msk [vmem:[#allocation2 + $0x30] sm:$0xff] %vm2882_vm1, %v2878_v51 }
  0xe0   :  { %2963 = vst [vmem:[#allocation11_spill] sm:$0xff] %v2962_v62  ;;  %41 = vst.msk [vmem:[#allocation2 + $0x38] sm:$0xff] %vm2882_vm1, %v2878_v51 }
  0xe1   :  { %42 = vst.msk [vmem:[#allocation2 + $0x40] sm:$0xff] %vm2882_vm1, %v2878_v51  ;;  %43 = vst.msk [vmem:[#allocation2 + $0x48] sm:$0xff] %vm2882_vm1, %v2878_v51 }
  0xe2   :  { %44 = vst.msk [vmem:[#allocation2 + $0x50] sm:$0xff] %vm2882_vm1, %v2878_v51  ;;  %45 = vst.msk [vmem:[#allocation2 + $0x58] sm:$0xff] %vm2882_vm1, %v2878_v51 }
  0xe3   :  { %v1434_v2 = vpop.f32.mrf.mxu0  ;;  %46 = vst.msk [vmem:[#allocation2 + $0x60] sm:$0xff] %vm2882_vm1, %v2878_v51  ;;  %47 = vst.msk [vmem:[#allocation2 + $0x68] sm:$0xff] %vm2882_vm1, %v2878_v51 }
  0xe4   :  { %v380_v8 = vmul.f32 2.0, %v1434_v2  ;;  %v1446_v9 = vpop.f32.mrf.mxu1  ;;  %48 = vst.msk [vmem:[#allocation2 + $0x70] sm:$0xff] %vm2882_vm1, %v2878_v51  ;;  %49 = vst.msk [vmem:[#allocation2 + $0x78] sm:$0xff] %vm2882_vm1, %v2878_v51 }
  0xe5   :  { %v388_v10 = vmul.f32 2.0, %v1446_v9  ;;  %v181_v15 = vpop.f32.mrf.mxu0  ;;  %50 = vst.msk [vmem:[#allocation3] sm:$0xff] %vm2882_vm1, %v2878_v51  ;;  %51 = vst.msk [vmem:[#allocation3 + $0x8] sm:$0xff] %vm2882_vm1, %v2878_v51 }
  0xe6   :  { %52 = vst.msk [vmem:[#allocation3 + $0x10] sm:$0xff] %vm2882_vm1, %v2878_v51  ;;  %53 = vst.msk [vmem:[#allocation3 + $0x18] sm:$0xff] %vm2882_vm1, %v2878_v51  ;;  %v396_v32 = vsub.f32 %v2166_v6, %v380_v8  ;;  %v379_v19 = vmul.f32 2.0, %v181_v15  ;;  %v221_v37 = vpop.f32.mrf.mxu1  ;;  %v366_v6 = vadd.f32 %v2162_v0, %v1948_v26 }
  0xe7   :  { %54 = vst.msk [vmem:[#allocation3 + $0x20] sm:$0xff] %vm2882_vm1, %v2878_v51  ;;  %55 = vst.msk [vmem:[#allocation3 + $0x28] sm:$0xff] %vm2882_vm1, %v2878_v51  ;;  %v404_v46 = vsub.f32 %v2170_v41, %v388_v10  ;;  %v387_v50 = vmul.f32 2.0, %v221_v37  ;;  %v1437_v54 = vpop.f32.mrf.mxu0  ;;  %v374_v41 = vadd.f32 %v2162_v0, %v1964_v34 }
  0xe8   :  { %56 = vst.msk [vmem:[#allocation3 + $0x30] sm:$0xff] %vm2882_vm1, %v2878_v51  ;;  %57 = vst.msk [vmem:[#allocation3 + $0x38] sm:$0xff] %vm2882_vm1, %v2878_v51  ;;  %v2274_v58 = vmax.f32 %v396_v32, 0.0  ;;  %v395_v2 = vsub.f32 %v363_v27, %v379_v19  ;;  %v382_v9 = vmul.f32 2.0, %v1437_v54  ;;  %v1449_v4 = vpop.f32.mrf.mxu1 }
  0xe9   :  { %58 = vst.msk [vmem:[#allocation3 + $0x40] sm:$0xff] %vm2882_vm1, %v2878_v51  ;;  %59 = vst.msk [vmem:[#allocation3 + $0x48] sm:$0xff] %vm2882_vm1, %v2878_v51  ;;  %v403_v3 = vsub.f32 %v371_v43, %v387_v50  ;;  %v390_v25 = vmul.f32 2.0, %v1449_v4  ;;  %v191_v1 = vpop.f32.mrf.mxu0  ;;  %v365_v4 = vadd.f32 %v2162_v0, %v1944_v24  ;;  %v368_v24 = vadd.f32 %v2162_v0, %v1952_v28 }
  0xea   :  { %60 = vst.msk [vmem:[#allocation3 + $0x50] sm:$0xff] %vm2882_vm1, %v2878_v51  ;;  %61 = vst.msk [vmem:[#allocation3 + $0x58] sm:$0xff] %vm2882_vm1, %v2878_v51  ;;  %1492 = vrsqrt.f32 %v2274_v58  ;;  %v2281_v33 = vmax.f32 %v395_v2, 0.0  ;;  %v231_v8 = vpop.f32.mrf.mxu1  ;;  %v398_v27 = vsub.f32 %v366_v6, %v382_v9  ;;  %v381_v37 = vmul.f32 2.0, %v191_v1 }
  0xeb   :  { %62 = vst.msk [vmem:[#allocation3 + $0x60] sm:$0xff] %vm2882_vm1, %v2878_v51  ;;  %63 = vst.msk [vmem:[#allocation3 + $0x68] sm:$0xff] %vm2882_vm1, %v2878_v51  ;;  %v2286_v10 = vmax.f32 %v403_v3, 0.0  ;;  %v1440_v15 = vpop.f32.mrf.mxu0  ;;  %v406_v26 = vsub.f32 %v374_v41, %v390_v25  ;;  %v389_v43 = vmul.f32 2.0, %v231_v8  ;;  %v373_v3 = vadd.f32 %v2162_v0, %v1966_v35 }
  0xec   :  { %64 = vst.msk [vmem:[#allocation3 + $0x70] sm:$0xff] %vm2882_vm1, %v2878_v51  ;;  %65 = vst.msk [vmem:[#allocation3 + $0x78] sm:$0xff] %vm2882_vm1, %v2878_v51  ;;  %v1452_v32 = vpop.f32.mrf.mxu1  ;;  %v2291_v19 = vmax.f32 %v398_v27, 0.0  ;;  %v376_v9 = vadd.f32 %v2162_v0, %v1968_v36  ;;  %v397_v25 = vsub.f32 %v365_v4, %v381_v37  ;;  %v367_v27 = vadd.f32 %v2162_v0, %v1954_v29 }
  0xed   :  { %66 = vst.msk [vmem:[#allocation4] sm:$0xff] %vm2882_vm1, %v2878_v51  ;;  %68 = vst.msk [vmem:[#allocation4 + $0x10] sm:$0xff] %vm2882_vm1, %v2878_v51  ;;  %v201_v50 = vpop.f32.mrf.mxu0  ;;  %v2296_v54 = vmax.f32 %v406_v26, 0.0  ;;  %v392_v2 = vmul.f32 2.0, %v1452_v32  ;;  %v405_v1 = vsub.f32 %v373_v3, %v389_v43  ;;  %v2313_v36 = vstv %s2852_s0 }
  0xee   :  { %69 = vst.msk [vmem:[#allocation4 + $0x18] sm:$0xff] %vm2882_vm1, %v2878_v51  ;;  %70 = vst.msk [vmem:[#allocation4 + $0x20] sm:$0xff] %vm2882_vm1, %v2878_v51  ;;  %v241_v34 = vpop.f32.mrf.mxu1  ;;  %v383_v6 = vmul.f32 2.0, %v201_v50  ;;  %v2303_v41 = vmax.f32 %v397_v25, 0.0  ;;  %v370_v4 = vadd.f32 %v2162_v0, %v1956_v30  ;;  %v369_v26 = vadd.f32 %v2162_v0, %v1958_v31 }
  0xef   :  { %71 = vst.msk [vmem:[#allocation4 + $0x28] sm:$0xff] %vm2882_vm1, %v2878_v51  ;;  %72 = vst.msk [vmem:[#allocation4 + $0x30] sm:$0xff] %vm2882_vm1, %v2878_v51  ;;  %v391_v8 = vmul.f32 2.0, %v241_v34  ;;  %v2308_v32 = vmax.f32 %v405_v1, 0.0  ;;  %v1443_v28 = vpop.f32.mrf.mxu0  ;;  %v375_v37 = vadd.f32 %v2162_v0, %v1971_v38  ;;  %v377_v50 = vadd.f32 %v2162_v0, %v1982_v42 }
  0xf0   :  { %73 = vst.msk [vmem:[#allocation4 + $0x38] sm:$0xff] %vm2882_vm1, %v2878_v51  ;;  %74 = vst.msk [vmem:[#allocation4 + $0x40] sm:$0xff] %vm2882_vm1, %v2878_v51  ;;  %v1455_v43 = vpop.f32.mrf.mxu1  ;;  %v399_v34 = vsub.f32 %v367_v27, %v383_v6  ;;  %v386_v3 = vmul.f32 2.0, %v1443_v28  ;;  %v439_v38 = vand.u32 2147483648, %v2274_v58  ;;  %vm2964_vm15 = vcmp.eq.f32.partialorder %v2274_v58, inf }
  0xf1   :  { %75 = vst.msk [vmem:[#allocation4 + $0x48] sm:$0xff] %vm2882_vm1, %v2878_v51  ;;  %76 = vst.msk [vmem:[#allocation4 + $0x50] sm:$0xff] %vm2882_vm1, %v2878_v51  ;;  %v407_v31 = vsub.f32 %v375_v37, %v391_v8  ;;  %vm2970_vm5 = vcmp.eq.f32.partialorder %v2296_v54, inf  ;;  %vm508_vm12 = vcmp.eq.f32.partialorder %v2296_v54, 0.0 }
  0xf2   :  { %77 = vst.msk [vmem:[#allocation4 + $0x58] sm:$0xff] %vm2882_vm1, %v2878_v51  ;;  %78 = vst.msk [vmem:[#allocation4 + $0x60] sm:$0xff] %vm2882_vm1, %v2878_v51  ;;  %v251_v1 = vpop.f32.mrf.mxu1  ;;  %v402_v37 = vsub.f32 %v370_v4, %v386_v3 }
  0xf3   :  { %79 = vst.msk [vmem:[#allocation4 + $0x68] sm:$0xff] %vm2882_vm1, %v2878_v51  ;;  %80 = vst.msk [vmem:[#allocation4 + $0x70] sm:$0xff] %vm2882_vm1, %v2878_v51  ;;  %v2346_v28 = vmax.f32 %v407_v31, 0.0 }
  0xf4   :  { %81 = vst.msk [vmem:[#allocation4 + $0x78] sm:$0xff] %vm2882_vm1, %v2878_v51  ;;  %v2276_v51 = vmax.f32 %v404_v46, 0.0  ;;  %v384_v46 = vmul.f32 2.0, %v1440_v15  ;;  %v408_v15 = vsub.f32 %v376_v9, %v392_v2  ;;  %v2354_v17 = vmax.f32 %v402_v37, 0.0 }
  0xf6   :  { %1494 = vrsqrt.f32 %v2276_v51  ;;  %v400_v35 = vsub.f32 %v368_v24, %v384_v46  ;;  %v378_v46 = vadd.f32 %v2162_v0, %v1973_v39  ;;  %v2329_v30 = vmax.f32 %v408_v15, 0.0  ;;  %v211_v24 = vpop.f32.mrf.mxu0 }
  0xf7   :  { %1496 = vrsqrt.f32 %v2281_v33  ;;  %v1493_v2 = vpop.eup %1492  ;;  %v394_v39 = vmul.f32 2.0, %v1455_v43  ;;  %vm492_vm11 = vcmp.eq.f32.partialorder %v2276_v51, inf  ;;  %v495_v42 = vand.u32 2147483648, %v2276_v51 }
  0xf8   :  { %1498 = vrsqrt.f32 %v2286_v10  ;;  %v2321_v29 = vmax.f32 %v400_v35, 0.0  ;;  %v435_v6 = vmul.f32 %v1493_v2, %v2274_v58  ;;  %v2342_v15 = vmax.f32 %v399_v34, 0.0 }
  0xf9   :  { %1500 = vrsqrt.f32 %v2291_v19  ;;  %v385_v43 = vmul.f32 2.0, %v211_v24  ;;  %v410_v25 = vsub.f32 %v378_v46, %v394_v39  ;;  %v393_v0 = vmul.f32 2.0, %v251_v1 }
  0xfa   :  { %1502 = vrsqrt.f32 %v2296_v54  ;;  %vm494_vm1 = vcmp.eq.f32.partialorder %v2276_v51, 0.0  ;;  %v509_v34 = vand.u32 2147483648, %v2296_v54  ;;  %v446_v35 = vand.u32 2147483648, %v2303_v41 }
  0xfb   :  { %1504 = vrsqrt.f32 %v2303_v41  ;;  %v401_v62 = vsub.f32 %v369_v26, %v385_v43  ;;  %v409_v31 = vsub.f32 %v377_v50, %v393_v0  ;;  %v437_v46 = vsel %vm2964_vm15, %v2274_v58, %v435_v6 }
  0xfc   :  { %1506 = vrsqrt.f32 %v2308_v32  ;;  %v467_v39 = vand.u32 2147483648, %v2321_v29  ;;  %vm438_vm15 = vcmp.eq.f32.partialorder %v2274_v58, 0.0  ;;  %vm466_vm10 = vcmp.eq.f32.partialorder %v2321_v29, 0.0 }
  0xfd   :  { %1508 = vrsqrt.f32 %v2321_v29  ;;  %v2372_v0 = vmax.f32 %v409_v31, 0.0  ;;  %v440_v6 = vsel %vm438_vm15, %v439_v38, %v437_v46  ;;  %vm2965_vm15 = vcmp.eq.f32.partialorder %v2281_v33, inf }
  0xfe   :  { %1510 = vrsqrt.f32 %v2329_v30 }
  0xff   :  { %1512 = vrsqrt.f32 %v2342_v15 }
 0x100   :  { %1514 = vrsqrt.f32 %v2346_v28 }
 0x101   :  { %1516 = vrsqrt.f32 %v2354_v17 }
 0x103   :  { %v1495_v9 = vpop.eup %1494 }
 0x104   :  { %v491_v8 = vmul.f32 %v1495_v9, %v2276_v51  ;;  %v1497_v27 = vpop.eup %1496 }
 0x105   :  { %v1499_v9 = vpop.eup %1498  ;;  %v428_v3 = vmul.f32 %v1497_v27, %v2281_v33 }
 0x106   :  { %v493_v2 = vsel %vm492_vm11, %v2276_v51, %v491_v8  ;;  %v502_v51 = vand.u32 2147483648, %v2308_v32  ;;  %v1501_v26 = vpop.eup %1500  ;;  %v484_v24 = vmul.f32 %v1499_v9, %v2286_v10  ;;  %vm2966_vm11 = vcmp.eq.f32.partialorder %v2286_v10, inf }
 0x107   :  { %v496_v23 = vsel %vm494_vm1, %v495_v42, %v493_v2  ;;  %v1503_v50 = vpop.eup %1502  ;;  %v2370_v42 = vmax.f32 %v401_v62, 0.0  ;;  %v449_v58 = vmul.f32 %v1501_v26, %v2291_v19  ;;  %v430_v38 = vsel %vm2965_vm15, %v2281_v33, %v428_v3 }
 0x108   :  { %v548_v4 = vsub.f32 0.0, %v496_v23  ;;  %v2367_v23 = vmax.f32 %v410_v25, 0.0  ;;  %v540_v25 = vsub.f32 0.0, %v440_v6  ;;  %v1505_v37 = vpop.eup %1504  ;;  %v505_v2 = vmul.f32 %v1503_v50, %v2296_v54 }
 0x109   :  { %1518 = vrsqrt.f32 %v2370_v42  ;;  %v1507_v43 = vpop.eup %1506  ;;  %v486_v31 = vsel %vm2966_vm11, %v2286_v10, %v484_v24  ;;  %vm431_vm1 = vcmp.eq.f32.partialorder %v2281_v33, 0.0  ;;  %v442_v3 = vmul.f32 %v1505_v37, %v2303_v41 }
 0x10a   :  { %v565_v1 = vmul.f32 %v2313_v36, %v548_v4  ;;  %1520 = vrsqrt.f32 %v2367_v23  ;;  %v1509_v4 = vpop.eup %1508  ;;  %v557_v50 = vmul.f32 %v2313_v36, %v540_v25  ;;  %v2967_v6 = vand.u32 2147483648, %v2281_v33 }
 0x10b   :  { %1522 = vrsqrt.f32 %v2372_v0  ;;  %vm487_vm15 = vcmp.eq.f32.partialorder %v2286_v10, 0.0  ;;  %v498_v62 = vmul.f32 %v1507_v43, %v2308_v32  ;;  %v1511_v27 = vpop.eup %1510  ;;  %v463_v37 = vmul.f32 %v1509_v4, %v2321_v29 }
 0x10c   :  { %v590_v26 = vmul.f32 1.442695, %v565_v1  ;;  %v433_v9 = vsel %vm431_vm1, %v2967_v6, %v430_v38  ;;  %v2968_v1 = vand.u32 2147483648, %v2286_v10  ;;  %v574_v25 = vmul.f32 1.442695, %v557_v50  ;;  %v1513_v50 = vpop.eup %1512 }
 0x10d   :  { %v539_v24 = vsub.f32 0.0, %v433_v9  ;;  %vm2969_vm1 = vcmp.eq.f32.partialorder %v2291_v19, inf  ;;  %vm452_vm11 = vcmp.eq.f32.partialorder %v2291_v19, 0.0  ;;  %v507_v43 = vsel %vm2970_vm5, %v2296_v54, %v505_v2  ;;  %v1515_v54 = vpop.eup %1514 }
 0x10e   :  { %1524 = vpow2.f32 %v590_v26  ;;  %v489_v46 = vsel %vm487_vm15, %v2968_v1, %v486_v31  ;;  %v451_v33 = vsel %vm2969_vm1, %v2291_v19, %v449_v58  ;;  %v2971_v9 = vand.u32 2147483648, %v2291_v19  ;;  %v1517_v1 = vpop.eup %1516 }
 0x10f   :  { %v547_v8 = vsub.f32 0.0, %v489_v46  ;;  %v556_v38 = vmul.f32 %v2313_v36, %v539_v24  ;;  %1526 = vpow2.f32 %v574_v25  ;;  %v510_v4 = vsel %vm508_vm12, %v509_v34, %v507_v43 }
 0x110   :  { %v454_v31 = vsel %vm452_vm11, %v2971_v9, %v451_v33  ;;  %v550_v26 = vsub.f32 0.0, %v510_v4  ;;  %vm2972_vm1 = vcmp.eq.f32.partialorder %v2303_v41, inf  ;;  %v519_v6 = vmul.f32 %v1511_v27, %v2329_v30 }
 0x111   :  { %v564_v10 = vmul.f32 %v2313_v36, %v547_v8  ;;  %v572_v58 = vmul.f32 1.442695, %v556_v38  ;;  %v542_v46 = vsub.f32 0.0, %v454_v31  ;;  %v444_v2 = vsel %vm2972_vm1, %v2303_v41, %v442_v3 }
 0x112   :  { %vm471_vm5 = vcmp.eq.f32.partialorder %v2370_v42, inf  ;;  %vm445_vm11 = vcmp.eq.f32.partialorder %v2303_v41, 0.0  ;;  %vm2973_vm12 = vcmp.eq.f32.partialorder %v2308_v32, inf  ;;  %v567_v24 = vmul.f32 %v2313_v36, %v550_v26 }
 0x113   :  { %v588_v8 = vmul.f32 1.442695, %v564_v10  ;;  %v500_v19 = vsel %vm2973_vm12, %v2308_v32, %v498_v62  ;;  %1528 = vpow2.f32 %v572_v58  ;;  %v559_v34 = vmul.f32 %v2313_v36, %v542_v46 }
 0x114   :  { %vm501_vm1 = vcmp.eq.f32.partialorder %v2308_v32, 0.0  ;;  %v474_v27 = vand.u32 2147483648, %v2370_v42  ;;  %v447_v3 = vsel %vm445_vm11, %v446_v35, %v444_v2  ;;  %v594_v33 = vmul.f32 1.442695, %v567_v24 }
 0x115   :  { %1530 = vpow2.f32 %v588_v8  ;;  %v503_v62 = vsel %vm501_vm1, %v502_v51, %v500_v19  ;;  %v578_v25 = vmul.f32 1.442695, %v559_v34  ;;  %v541_v38 = vsub.f32 0.0, %v447_v3 }
 0x116   :  { %v549_v43 = vsub.f32 0.0, %v503_v62  ;;  %v1519_v10 = vpop.eup %1518  ;;  %v456_v9 = vmul.f32 %v1513_v50, %v2342_v15  ;;  %vm2974_vm12 = vcmp.eq.f32.partialorder %v2321_v29, inf  ;;  %vm2975_vm11 = vcmp.eq.f32.partialorder %v2329_v30, inf }
 0x117   :  { %v465_v31 = vsel %vm2974_vm12, %v2321_v29, %v463_v37  ;;  %v521_v41 = vsel %vm2975_vm11, %v2329_v30, %v519_v6  ;;  %v1521_v32 = vpop.eup %1520  ;;  %vm534_vm1 = vcmp.eq.f32.partialorder %v2367_v23, inf  ;;  %v470_v35 = vmul.f32 %v1519_v10, %v2370_v42 }
 0x118   :  { %v558_v51 = vmul.f32 %v2313_v36, %v541_v38  ;;  %v566_v4 = vmul.f32 %v2313_v36, %v549_v43  ;;  %vm522_vm15 = vcmp.eq.f32.partialorder %v2329_v30, 0.0  ;;  %v1523_v58 = vpop.eup %1522  ;;  %vm527_vm12 = vcmp.eq.f32.partialorder %v2372_v0, inf }
 0x119   :  { %1532 = vpow2.f32 %v594_v33  ;;  %v468_v37 = vsel %vm466_vm10, %v467_v39, %v465_v31  ;;  %v2976_v46 = vand.u32 2147483648, %v2329_v30  ;;  %v512_v2 = vmul.f32 %v1515_v54, %v2346_v28 }
 0x11a   :  { %v477_v50 = vmul.f32 %v1517_v1, %v2354_v17  ;;  %1534 = vpow2.f32 %v578_v25  ;;  %v592_v6 = vmul.f32 1.442695, %v566_v4  ;;  %v533_v19 = vmul.f32 %v1521_v32, %v2367_v23 }
 0x11b   :  { %v524_v26 = vsel %vm522_vm15, %v2976_v46, %v521_v41  ;;  %v1525_v8 = vpop.eup %1524  ;;  %v576_v34 = vmul.f32 1.442695, %v558_v51  ;;  %vm2977_vm11 = vcmp.eq.f32.partialorder %v2342_v15, inf  ;;  %v472_v29 = vsel %vm471_vm5, %v2370_v42, %v470_v35 }
 0x11c   :  { %v552_v24 = vsub.f32 0.0, %v524_v26  ;;  %v458_v3 = vsel %vm2977_vm11, %v2342_v15, %v456_v9  ;;  %v526_v30 = vmul.f32 %v1523_v58, %v2372_v0  ;;  %v787_v39 = vsel %vm1868_vm2, %v1525_v8, 0.0  ;;  %v1527_v25 = vpop.eup %1526 }
 0x11d   :  { %v544_v54 = vsub.f32 0.0, %v468_v37  ;;  %925 = vadd.xlane.f32.xlu1 %v787_v39  ;;  %v819_v62 = vsel %vm2106_vm0, %v787_v39, 0.0  ;;  %1536 = vpow2.f32 %v592_v6  ;;  %vm459_vm11 = vcmp.eq.f32.partialorder %v2342_v15, 0.0 }
 0x11e   :  { %v569_v1 = vmul.f32 %v2313_v36, %v552_v24  ;;  %v2978_v33 = vand.u32 2147483648, %v2342_v15  ;;  %vm2979_vm5 = vcmp.eq.f32.partialorder %v2346_v28, inf  ;;  %vm515_vm2 = vcmp.eq.f32.partialorder %v2346_v28, 0.0 }
 0x11f   :  { %v514_v43 = vsel %vm2979_vm5, %v2346_v28, %v512_v2  ;;  %vm2980_vm15 = vcmp.eq.f32.partialorder %v2354_v17, inf  ;;  %vm2981_vm10 = vnez %v2912_v44  ;;  %1538 = vpow2.f32 %v576_v34 }
 0x120   :  { %v461_v38 = vsel %vm459_vm11, %v2978_v33, %v458_v3  ;;  %v479_v5 = vsel %vm2980_vm15, %v2354_v17, %v477_v50  ;;  %v779_v10 = vsel %vm2981_vm10, %v1527_v25, 0.0  ;;  %v598_v9 = vmul.f32 1.442695, %v569_v1  ;;  %v1529_v51 = vpop.eup %1528 }
 0x121   :  { %v2982_v31 = vand.u32 2147483648, %v2346_v28  ;;  %v528_v15 = vsel %vm527_vm12, %v2372_v0, %v526_v30  ;;  %909 = vadd.xlane.f32.xlu0 %v779_v10  ;;  %v561_v32 = vmul.f32 %v2313_v36, %v544_v54  ;;  %vm480_vm11 = vcmp.eq.f32.partialorder %v2354_v17, 0.0 }
 0x122   :  { %1540 = vpow2.f32 %v598_v9  ;;  %v543_v4 = vsub.f32 0.0, %v461_v38  ;;  %v2983_v44 = vand.u32 2147483648, %v2354_v17  ;;  %v535_v28 = vsel %vm534_vm1, %v2367_v23, %v533_v19  ;;  %v1531_v37 = vpop.eup %1530 }
 0x123   :  { %v517_v41 = vsel %vm515_vm2, %v2982_v31, %v514_v43  ;;  %vm2984_vm10 = vnez %v2914_v47  ;;  %vm536_vm12 = vcmp.eq.f32.partialorder %v2367_v23, 0.0  ;;  %v530_v50 = vand.u32 2147483648, %v2372_v0 }
 0x124   :  { %v551_v35 = vsub.f32 0.0, %v517_v41  ;;  %v482_v58 = vsel %vm480_vm11, %v2983_v44, %v479_v5  ;;  %v778_v46 = vsel %vm2984_vm10, %v1529_v51, 0.0  ;;  %vm2985_vm15 = vnez %v2916_v49 }
 0x125   :  { %v546_v2 = vsub.f32 0.0, %v482_v58  ;;  %v811_v6 = vsel %vm2985_vm15, %v779_v10, 0.0  ;;  %907 = vadd.xlane.f32.xlu1 %v778_v46  ;;  %v786_v17 = vsel %vm1893_vm8, %v1531_v37, 0.0  ;;  %v2986_v8 = vand.u32 2147483648, %v2367_v23 }
 0x126   :  { %v568_v26 = vmul.f32 %v2313_v36, %v551_v35  ;;  %828 = vadd.xlane.f32.xlu0 %v811_v6  ;;  %v818_v47 = vsel %vm2113_vm14, %v786_v17, 0.0  ;;  %v582_v30 = vmul.f32 1.442695, %v561_v32  ;;  %vm2987_vm1 = vcmp.eq.f32.partialorder %v2370_v42, 0.0  ;;  %v1533_v39 = vpop.eup %1532  ;;  %v3002_v6 = vld [vmem:[#allocation10_spill] sm:$0xff] }
 0x127   :  { %v538_v19 = vsel %vm536_vm12, %v2986_v8, %v535_v28  ;;  %v563_v24 = vmul.f32 %v2313_v36, %v546_v2  ;;  %v475_v49 = vsel %vm2987_vm1, %v474_v27, %v472_v29  ;;  %vm2988_vm5 = vcmp.eq.f32.partialorder %v2372_v0, 0.0  ;;  %v1535_v25 = vpop.eup %1534  ;;  %v3004_v8 = vld [vmem:[#allocation6_spill] sm:$0xff] }
 0x128   :  { %v596_v34 = vmul.f32 1.442695, %v568_v26  ;;  %v554_v3 = vsub.f32 0.0, %v538_v19  ;;  %v531_v12 = vsel %vm2988_vm5, %v530_v50, %v528_v15  ;;  %v560_v23 = vmul.f32 %v2313_v36, %v543_v4  ;;  %v3006_v19 = vld [vmem:[#allocation11_spill] sm:$0xff] }
 0x129   :  { %v586_v54 = vmul.f32 1.442695, %v563_v24  ;;  %842 = vadd.xlane.f32.xlu1 %v818_v47  ;;  %v789_v33 = vsel %vm1876_vm4, %v1533_v39, 0.0  ;;  %v545_v38 = vsub.f32 0.0, %v475_v49  ;;  %v553_v43 = vsub.f32 0.0, %v531_v12  ;;  %v3010_v24 = vld [vmem:[#allocation9_spill] sm:$0xff] }
 0x12a   :  { %1542 = vpow2.f32 %v596_v34  ;;  %v571_v1 = vmul.f32 %v2313_v36, %v554_v3  ;;  %844 = vadd.xlane.f32.xlu0 %v819_v62  ;;  %v821_v42 = vsel %vm2120_vm9, %v789_v33, 0.0  ;;  %v1537_v5 = vpop.eup %1536  ;;  %v781_v10 = vsel %vm2016_vm13, %v1535_v25, 0.0  ;;  %v3008_v34 = vld [vmem:[#allocation7_spill] sm:$0xff]  ;;  %v3012_v3 = vld [vmem:[#allocation8_spill] sm:$0xff]  ;;  %v971_v39 = vld [vmem:[#allocation4] sm:$0xff] }
 0x12b   :  { %1544 = vpow2.f32 %v586_v54  ;;  %v562_v27 = vmul.f32 %v2313_v36, %v545_v38  ;;  %v570_v29 = vmul.f32 %v2313_v36, %v553_v43  ;;  %v580_v9 = vmul.f32 1.442695, %v560_v23  ;;  %v972_v49 = vld [vmem:[#allocation4 + $0x8] sm:$0xff]  ;;  %v974_v54 = vld [vmem:[#allocation4 + $0x18] sm:$0xff]  ;;  %v973_v38 = vld [vmem:[#allocation4 + $0x10] sm:$0xff] }
 0x12c   :  { %v602_v0 = vmul.f32 1.442695, %v571_v1  ;;  %1546 = vpow2.f32 %v582_v30  ;;  %vm2989_vm4 = vnez %v2899_v14  ;;  %v1539_v41 = vpop.eup %1538  ;;  %vm2990_vm8 = vnez %v2950_v48 }
 0x12d   :  { %913 = vadd.xlane.f32.xlu1 %v781_v10  ;;  %v788_v7 = vsel %vm2989_vm4, %v1537_v5, 0.0  ;;  %v584_v62 = vmul.f32 1.442695, %v562_v27  ;;  %v600_v31 = vmul.f32 1.442695, %v570_v29  ;;  %vm2991_vm2 = vnez %v2920_v55 }
 0x12e   :  { %1548 = vpow2.f32 %v602_v0  ;;  %923 = vadd.xlane.f32.xlu0 %v786_v17  ;;  %v820_v15 = vsel %vm2990_vm8, %v788_v7, 0.0  ;;  %v810_v53 = vsel %vm2991_vm2, %v778_v46, 0.0  ;;  %vm2992_vm13 = vnez %v2922_v57 }
 0x12f   :  { %1550 = vpow2.f32 %v584_v62  ;;  %v1541_v32 = vpop.eup %1540  ;;  %v780_v36 = vsel %vm2992_vm13, %v1539_v41, 0.0  ;;  %vm2993_vm11 = vnez %v2895_v11  ;;  %vm2994_vm10 = vnez %v2953_v52 }
 0x130   :  { %1552 = vpow2.f32 %v600_v31  ;;  %v791_v14 = vsel %vm2993_vm11, %v1541_v32, 0.0  ;;  %vm2995_vm12 = vnez %v2928_v63  ;;  %vm2996_vm15 = vnez %v2924_v59 }
 0x131   :  { %929 = vadd.xlane.f32.xlu1 %v789_v33  ;;  %1554 = vpow2.f32 %v580_v9  ;;  %v823_v35 = vsel %vm2994_vm10, %v791_v14, 0.0  ;;  %v812_v51 = vsel %vm2995_vm12, %v780_v36, 0.0  ;;  %v813_v55 = vsel %vm2996_vm15, %v781_v10, 0.0  ;;  %v975_v9 = vld [vmem:[#allocation4 + $0x20] sm:$0xff] }
 0x132   :  { %826 = vadd.xlane.f32.xlu0 %v810_v53  ;;  %vm2997_vm1 = vnez %v2901_v16  ;;  %vm2998_vm5 = vnez %v2939_v13  ;;  %vm2999_vm4 = vnez %v2959_v60  ;;  %vm3001_vm2 = vnez %v2907_v22  ;;  %v803_v60 = vld [vmem:[#allocation2 + $0x48] sm:$0xff] }
 0x133   :  { %vm3003_vm13 = vnez %v3002_v6  ;;  %vm3005_vm11 = vnez %v3004_v8  ;;  %vm3009_vm12 = vnez %v3008_v34  ;;  %vm3011_vm15 = vnez %v3010_v24  ;;  %v802_v8 = vld [vmem:[#allocation2 + $0x40] sm:$0xff] }
 0x134   :  { %v3016_v27 = vmov 0.0  }
 0x135   :  { %830 = vadd.xlane.f32.xlu1 %v812_v51  ;;  %v1342_v29 = vsel %vm3003_vm13, 1.0, %v3016_v27  ;;  %v1344_v41 = vsel %vm2113_vm14, 1.0, %v3016_v27 }
 0x136   :  { %832 = vadd.xlane.f32.xlu0 %v813_v55  ;;  %v1348_v55 = vsel %vm2141_vm3, 1.0, %v3016_v27 }
 0x137   :  { %v1543_v4 = vpop.eup %1542 }
 0x138   :  { %v790_v57 = vsel %vm2954_vm7, %v1543_v4, 0.0  ;;  %v1545_v44 = vpop.eup %1544  ;;  %vm3000_vm7 = vnez %v2926_v61 }
 0x139   :  { %v822_v11 = vsel %vm2141_vm3, %v790_v57, 0.0  ;;  %v1547_v58 = vpop.eup %1546  ;;  %v785_v28 = vsel %vm2997_vm1, %v1545_v44, 0.0  ;;  %846 = vadd.xlane.f32.xlu1 %v820_v15  ;;  %vm3013_vm1 = vnez %v3012_v3 }
 0x13a   :  { %v817_v63 = vsel %vm2998_vm5, %v785_v28, 0.0  ;;  %848 = vadd.xlane.f32.xlu0 %v821_v42  ;;  %v783_v26 = vsel %vm3000_vm7, %v1547_v58, 0.0  ;;  %vm3014_vm7 = vcmask 7168   ;;  %v976_v42 = vld [vmem:[#allocation4 + $0x28] sm:$0xff]  ;;  %v1347_v58 = vsel %vm2120_vm9, 1.0, %v3016_v27 }
 0x13b   :  { %v1549_v37 = vpop.eup %1548  ;;  %v815_v30 = vsel %vm3013_vm1, %v783_v26, 0.0 }
 0x13c   :  { %v793_v59 = vsel %vm2957_vm6, %v1549_v37, 0.0  ;;  %v1551_v46 = vpop.eup %1550  ;;  %vm3007_vm6 = vnez %v3006_v19  ;;  %v1351_v37 = vsel %vm2999_vm4, 1.0, %v3016_v27 }
 0x13d   :  { %v825_v21 = vsel %vm2999_vm4, %v793_v59, 0.0  ;;  %v1553_v2 = vpop.eup %1552  ;;  %917 = vadd.xlane.f32.xlu1 %v783_v26  ;;  %v784_v16 = vsel %vm3001_vm2, %v1551_v46, 0.0  ;;  %vm3015_vm2 = vmmov %vm3014_vm7  ;;  %v1350_v20 = vsel %vm3007_vm6, 1.0, %v3016_v27  ;;  %v892_v46 = vld [vmem:[#allocation3 + $0x8] sm:$0xff] }
 0x13e   :  { %v1555_v50 = vpop.eup %1554  ;;  %911 = vadd.xlane.f32.xlu0 %v780_v36  ;;  %v816_v17 = vsel %vm3003_vm13, %v784_v16, 0.0  ;;  %v792_v18 = vsel %vm3005_vm11, %v1553_v2, 0.0  ;;  %vm3017_vm11 = vmmov %vm3015_vm2  ;;  %v891_v2 = vld [vmem:[#allocation3] sm:$0xff] }
 0x13f   :  { %v824_v47 = vsel %vm3007_vm6, %v792_v18, 0.0  ;;  %v782_v61 = vsel %vm3009_vm12, %v1555_v50, 0.0  ;;  %vm3018_vm12 = vmmov %vm3015_vm2 }
 0x140   :  { %v814_v22 = vsel %vm3011_vm15, %v782_v61, 0.0  ;;  %vm3019_vm13 = vmmov %vm3015_vm2 }
 0x141   :  { %933 = vadd.xlane.f32.xlu1 %v791_v14  ;;  %vm3020_vm1 = vmmov %vm3015_vm2  ;;  %v1346_v14 = vsel %vm2990_vm8, 1.0, %v3016_v27 }
 0x142   :  { %927 = vadd.xlane.f32.xlu0 %v788_v7  ;;  %vm3023_vm8 = vmmov %vm3020_vm1 }
 0x143   :  { %vm3025_vm3 = vmmov %vm3020_vm1 }
 0x145   :  { %834 = vadd.xlane.f32.xlu1 %v814_v22  ;;  %v899_v22 = vld [vmem:[#allocation3 + $0x40] sm:$0xff] }
 0x146   :  { %836 = vadd.xlane.f32.xlu0 %v815_v30 }
 0x149   :  { %850 = vadd.xlane.f32.xlu1 %v822_v11 }
 0x14a   :  { %852 = vadd.xlane.f32.xlu0 %v823_v35  ;;  %v1343_v35 = vsel %vm2998_vm5, 1.0, %v3016_v27 }
 0x14b   :  { %v1022_v12 = vpop.xlane.xlu0 %1021 }
 0x14c   :  { %v1052_v23 = vadd.f32 %v1022_v12, %v972_v49 }
 0x14d   :  { %921 = vadd.xlane.f32.xlu1 %v785_v28  ;;  %v1020_v1 = vpop.xlane.xlu1 %1019  ;;  %v1349_v28 = vsel %vm2994_vm10, 1.0, %v3016_v27 }
 0x14e   :  { %915 = vadd.xlane.f32.xlu0 %v782_v61  ;;  %1068 = vst.msk [vmem:[#allocation4 + $0x8] sm:$0xff] %vm3014_vm7, %v1052_v23  ;;  %v1051_v25 = vadd.f32 %v1020_v1, %v971_v39  ;;  %vm3021_vm7 = vmmov %vm3020_vm1  ;;  %v894_v61 = vld [vmem:[#allocation3 + $0x18] sm:$0xff]  ;;  %v794_v1 = vld [vmem:[#allocation2] sm:$0xff] }
 0x14f   :  { %v1026_v33 = vpop.xlane.xlu0 %1025  ;;  %v902_v23 = vld [vmem:[#allocation3 + $0x58] sm:$0xff] }
 0x150   :  { %v1054_v43 = vadd.f32 %v1026_v33, %v974_v54  ;;  %1067 = vst.msk [vmem:[#allocation4] sm:$0xff] %vm3015_vm2, %v1051_v25 }
 0x151   :  { %937 = vadd.xlane.f32.xlu1 %v793_v59  ;;  %v1024_v0 = vpop.xlane.xlu1 %1023 }
 0x152   :  { %931 = vadd.xlane.f32.xlu0 %v790_v57  ;;  %1070 = vst.msk [vmem:[#allocation4 + $0x18] sm:$0xff] %vm3017_vm11, %v1054_v43  ;;  %v1053_v5 = vadd.f32 %v1024_v0, %v973_v38  ;;  %vm3022_vm11 = vmmov %vm3020_vm1  ;;  %v1345_v57 = vsel %vm2106_vm0, 1.0, %v3016_v27  ;;  %v796_v0 = vld [vmem:[#allocation2 + $0x10] sm:$0xff] }
 0x153   :  { %v1030_v10 = vpop.xlane.xlu0 %1029  ;;  %vm3026_vm0 = vmmov %vm3025_vm3 }
 0x154   :  { %v1056_v7 = vadd.f32 %v1030_v10, %v976_v42  ;;  %1069 = vst.msk [vmem:[#allocation4 + $0x10] sm:$0xff] %vm3018_vm12, %v1053_v5  ;;  %vm3027_vm6 = vmmov %vm3026_vm0 }
 0x155   :  { %838 = vadd.xlane.f32.xlu1 %v816_v17  ;;  %v2580_v62 = vld [vmem:[#allocation4 + $0x8] sm:$0xff]  ;;  %v1028_v31 = vpop.xlane.xlu1 %1027  ;;  %vm3028_vm9 = vmmov %vm3026_vm0 }
 0x156   :  { %840 = vadd.xlane.f32.xlu0 %v817_v63  ;;  %vm1103_vm15 = vcmp.gt.f32.partialorder %v2580_v62, 0.0  ;;  %1072 = vst.msk [vmem:[#allocation4 + $0x28] sm:$0xff] %vm3019_vm13, %v1056_v7  ;;  %v1055_v15 = vadd.f32 %v1028_v31, %v975_v9  ;;  %vm3024_vm13 = vmmov %vm3020_vm1  ;;  %v900_v63 = vld [vmem:[#allocation3 + $0x48] sm:$0xff]  ;;  %v806_v62 = vld [vmem:[#allocation2 + $0x60] sm:$0xff] }
 0x157   :  { %v1353_v32 = vsel %vm1103_vm15, 1.0, %v3016_v27  ;;  %v2590_v53 = vld [vmem:[#allocation4] sm:$0xff]  ;;  %vm3029_vm10 = vmmov %vm3026_vm0 }
 0x158   :  { %1311 = vst.msk [vmem:[%s2853_s8 + $0x8] sm:$0xff] %vm3020_vm1, %v1353_v32  ;;  %vm1102_vm14 = vcmp.gt.f32.partialorder %v2590_v53, 0.0  ;;  %vm3030_vm4 = vmmov %vm3026_vm0  ;;  %v805_v32 = vld [vmem:[#allocation2 + $0x58] sm:$0xff] }
 0x159   :  { %854 = vadd.xlane.f32.xlu1 %v824_v47  ;;  %1071 = vst.msk [vmem:[#allocation4 + $0x20] sm:$0xff] %vm3021_vm7, %v1055_v15  ;;  %v2598_v40 = vld [vmem:[#allocation4 + $0x18] sm:$0xff]  ;;  %v1352_v36 = vsel %vm1102_vm14, 1.0, %v3016_v27  ;;  %vm3031_vm7 = vmmov %vm3026_vm0  ;;  %v804_v15 = vld [vmem:[#allocation2 + $0x50] sm:$0xff] }
 0x15a   :  { %856 = vadd.xlane.f32.xlu0 %v825_v21  ;;  %vm1105_vm2 = vcmp.gt.f32.partialorder %v2598_v40, 0.0  ;;  %1310 = vst.msk [vmem:[%s2853_s8] sm:$0xff] %vm3022_vm11, %v1352_v36  ;;  %vm3032_vm11 = vmmov %vm3026_vm0 }
 0x15b   :  { %v1355_v51 = vsel %vm1105_vm2, 1.0, %v3016_v27  ;;  %v2617_v4 = vld [vmem:[#allocation4 + $0x10] sm:$0xff] }
 0x15c   :  { %1313 = vst.msk [vmem:[%s2853_s8 + $0x18] sm:$0xff] %vm3023_vm8, %v1355_v51  ;;  %vm1104_vm12 = vcmp.gt.f32.partialorder %v2617_v4, 0.0  ;;  %vm3033_vm8 = vmmov %vm3026_vm0 }
 0x15d   :  { %1031 = vadd.xlane.f32.xlu1 %v1342_v29  ;;  %v2624_v48 = vld [vmem:[#allocation4 + $0x28] sm:$0xff]  ;;  %v1354_v13 = vsel %vm1104_vm12, 1.0, %v3016_v27  ;;  %v797_v29 = vld [vmem:[#allocation2 + $0x18] sm:$0xff] }
 0x15e   :  { %919 = vadd.xlane.f32.xlu0 %v784_v16  ;;  %vm1107_vm5 = vcmp.gt.f32.partialorder %v2624_v48, 0.0  ;;  %1312 = vst.msk [vmem:[%s2853_s8 + $0x10] sm:$0xff] %vm3024_vm13, %v1354_v13  ;;  %v795_v16 = vld [vmem:[#allocation2 + $0x8] sm:$0xff]  ;;  %vm3034_vm13 = vmmov %vm3026_vm0 }
 0x15f   :  { %v1357_v44 = vsel %vm1107_vm5, 1.0, %v3016_v27 }
 0x160   :  { %v2643_v11 = vld [vmem:[#allocation4 + $0x20] sm:$0xff]  ;;  %1315 = vst.msk [vmem:[%s2853_s8 + $0x28] sm:$0xff] %vm3025_vm3, %v1357_v44  ;;  %vm3035_vm3 = vmmov %vm3026_vm0 }
 0x161   :  { %1035 = vadd.xlane.f32.xlu1 %v1344_v41  ;;  %vm1106_vm1 = vcmp.gt.f32.partialorder %v2643_v11, 0.0 }
 0x162   :  { %935 = vadd.xlane.f32.xlu0 %v792_v18  ;;  %v1356_v56 = vsel %vm1106_vm1, 1.0, %v3016_v27 }
 0x163   :  { %1314 = vst.msk [vmem:[%s2853_s8 + $0x20] sm:$0xff] %vm3026_vm0, %v1356_v56  ;;  %v893_v56 = vld [vmem:[#allocation3 + $0x10] sm:$0xff] }
 0x165   :  { %1039 = vadd.xlane.f32.xlu1 %v1346_v14 }
 0x166   :  { %1033 = vadd.xlane.f32.xlu0 %v1343_v35 }
 0x169   :  { %1043 = vadd.xlane.f32.xlu1 %v1348_v55  ;;  %v896_v55 = vld [vmem:[#allocation3 + $0x28] sm:$0xff] }
 0x16a   :  { %1037 = vadd.xlane.f32.xlu0 %v1345_v57 }
 0x16d   :  { %1047 = vadd.xlane.f32.xlu1 %v1350_v20 }
 0x16e   :  { %1041 = vadd.xlane.f32.xlu0 %v1347_v58 }
 0x172   :  { %1045 = vadd.xlane.f32.xlu0 %v1349_v28 }
 0x176   :  { %1049 = vadd.xlane.f32.xlu0 %v1351_v37 }
 0x1a6   :  { %v926_v59 = vpop.xlane.xlu1 %925 }
 0x1a7   :  { %v948_v21 = vadd.f32 %v926_v59, %v900_v63 }
 0x1a9   :  { %964 = vst.msk [vmem:[#allocation3 + $0x48] sm:$0xff] %vm3027_vm6, %v948_v21  ;;  %vm3036_vm6 = vmmov %vm3026_vm0 }
 0x1aa   :  { %v910_v26 = vpop.xlane.xlu0 %909 }
 0x1ab   :  { %v940_v45 = vadd.f32 %v910_v26, %v892_v46  ;;  %v904_v46 = vld [vmem:[#allocation3 + $0x68] sm:$0xff] }
 0x1ad   :  { %956 = vst.msk [vmem:[#allocation3 + $0x8] sm:$0xff] %vm3028_vm9, %v940_v45  ;;  %vm3037_vm9 = vmmov %vm3026_vm0  ;;  %v901_v45 = vld [vmem:[#allocation3 + $0x50] sm:$0xff] }
 0x1ae   :  { %v908_v52 = vpop.xlane.xlu1 %907 }
 0x1af   :  { %v829_v50 = vpop.xlane.xlu0 %828  ;;  %v939_v6 = vadd.f32 %v908_v52, %v891_v2 }
 0x1b0   :  { %v859_v17 = vadd.f32 %v829_v50, %v795_v16 }
 0x1b1   :  { %955 = vst.msk [vmem:[#allocation3] sm:$0xff] %vm3029_vm10, %v939_v6  ;;  %vm3038_vm10 = vmmov %vm3026_vm0 }
 0x1b2   :  { %876 = vst.msk [vmem:[#allocation2 + $0x8] sm:$0xff] %vm3030_vm4, %v859_v17  ;;  %v843_v18 = vpop.xlane.xlu1 %842  ;;  %vm3039_vm4 = vmmov %vm3026_vm0 }
 0x1b3   :  { %v845_v19 = vpop.xlane.xlu0 %844  ;;  %v866_v47 = vadd.f32 %v843_v18, %v802_v8  ;;  %v798_v8 = vld [vmem:[#allocation2 + $0x20] sm:$0xff] }
 0x1b4   :  { %v867_v34 = vadd.f32 %v845_v19, %v803_v60  ;;  %v1167_v24 = vld [vmem:[#allocation3 + $0x8] sm:$0xff] }
 0x1b5   :  { %883 = vst.msk [vmem:[#allocation2 + $0x40] sm:$0xff] %vm3031_vm7, %v866_v47  ;;  %v1183_v3 = vadd.f32 1e-08, %v1167_v24  ;;  %vm3040_vm7 = vmmov %vm3026_vm0  ;;  %v799_v60 = vld [vmem:[#allocation2 + $0x28] sm:$0xff] }
 0x1b6   :  { %884 = vst.msk [vmem:[#allocation2 + $0x48] sm:$0xff] %vm3032_vm11, %v867_v34  ;;  %v914_v30 = vpop.xlane.xlu1 %913  ;;  %vm3041_vm11 = vmmov %vm3026_vm0 }
 0x1b7   :  { %v924_v49 = vpop.xlane.xlu0 %923  ;;  %v942_v12 = vadd.f32 %v914_v30, %v894_v61  ;;  %1556 = vlog2.f32 %v1183_v3  ;;  %v807_v30 = vld [vmem:[#allocation2 + $0x68] sm:$0xff] }
 0x1b8   :  { %v947_v39 = vadd.f32 %v924_v49, %v899_v22  ;;  %v1166_v43 = vld [vmem:[#allocation3] sm:$0xff] }
 0x1b9   :  { %v1119_v54 = vld [vmem:[#allocation2 + $0x8] sm:$0xff]  ;;  %958 = vst.msk [vmem:[#allocation3 + $0x18] sm:$0xff] %vm3033_vm8, %v942_v12  ;;  %v1182_v10 = vadd.f32 1e-08, %v1166_v43  ;;  %vm3042_vm8 = vmmov %vm3026_vm0 }
 0x1ba   :  { %1558 = vlog2.f32 %v1119_v54  ;;  %963 = vst.msk [vmem:[#allocation3 + $0x40] sm:$0xff] %vm3034_vm13, %v947_v39  ;;  %v930_v25 = vpop.xlane.xlu1 %929  ;;  %vm3043_vm13 = vmmov %vm3026_vm0 }
 0x1bb   :  { %v950_v33 = vadd.f32 %v930_v25, %v902_v23  ;;  %v827_v38 = vpop.xlane.xlu0 %826  ;;  %1560 = vlog2.f32 %v1182_v10 }
 0x1bc   :  { %v858_v42 = vadd.f32 %v827_v38, %v794_v1 }
 0x1bd   :  { %966 = vst.msk [vmem:[#allocation3 + $0x58] sm:$0xff] %vm3035_vm3, %v950_v33  ;;  %vm3044_vm3 = vmmov %vm3026_vm0 }
 0x1be   :  { %875 = vst.msk [vmem:[#allocation2] sm:$0xff] %vm3026_vm0, %v858_v42  ;;  %v831_v5 = vpop.xlane.xlu1 %830  ;;  %v898_v42 = vld [vmem:[#allocation3 + $0x38] sm:$0xff] }
 0x1bf   :  { %v860_v9 = vadd.f32 %v831_v5, %v796_v0  ;;  %v833_v7 = vpop.xlane.xlu0 %832  ;;  %v895_v0 = vld [vmem:[#allocation3 + $0x20] sm:$0xff] }
 0x1c0   :  { %v1169_v31 = vld [vmem:[#allocation3 + $0x18] sm:$0xff]  ;;  %v861_v41 = vadd.f32 %v833_v7, %v797_v29 }
 0x1c1   :  { %877 = vst.msk [vmem:[#allocation2 + $0x10] sm:$0xff] %vm3036_vm6, %v860_v9  ;;  %v1185_v14 = vadd.f32 1e-08, %v1169_v31  ;;  %vm3046_vm6 = vmmov %vm3026_vm0 }
 0x1c2   :  { %878 = vst.msk [vmem:[#allocation2 + $0x18] sm:$0xff] %vm3037_vm9, %v861_v41  ;;  %v847_v36 = vpop.xlane.xlu1 %846  ;;  %vm3047_vm9 = vmmov %vm3026_vm0  ;;  %v1174_v41 = vld [vmem:[#allocation3 + $0x40] sm:$0xff] }
 0x1c3   :  { %v868_v35 = vadd.f32 %v847_v36, %v804_v15  ;;  %v849_v51 = vpop.xlane.xlu0 %848  ;;  %v1190_v53 = vadd.f32 1e-08, %v1174_v41 }
 0x1c4   :  { %v869_v13 = vadd.f32 %v849_v51, %v805_v32  ;;  %v1557_v57 = vpop.eup %1556  ;;  %v903_v51 = vld [vmem:[#allocation3 + $0x60] sm:$0xff] }
 0x1c5   :  { %v1118_v44 = vld [vmem:[#allocation2] sm:$0xff]  ;;  %885 = vst.msk [vmem:[#allocation2 + $0x50] sm:$0xff] %vm3038_vm10, %v868_v35  ;;  %v1201_v63 = vmul.f32 0.6931472, %v1557_v57  ;;  %vm3048_vm10 = vmmov %vm3026_vm0 }
 0x1c6   :  { %1562 = vlog2.f32 %v1118_v44  ;;  %886 = vst.msk [vmem:[#allocation2 + $0x58] sm:$0xff] %vm3039_vm4, %v869_v13  ;;  %v918_v20 = vpop.xlane.xlu1 %917  ;;  %vm3049_vm4 = vmmov %vm3026_vm0 }
 0x1c7   :  { %v1559_v58 = vpop.eup %1558  ;;  %1564 = vlog2.f32 %v1185_v14  ;;  %v944_v28 = vadd.f32 %v918_v20, %v896_v55  ;;  %v912_v37 = vpop.xlane.xlu0 %911  ;;  %v906_v14 = vld [vmem:[#allocation3 + $0x78] sm:$0xff] }
 0x1c8   :  { %v1137_v59 = vmul.f32 0.6931472, %v1559_v58  ;;  %v941_v21 = vadd.f32 %v912_v37, %v893_v56  ;;  %v1120_v19 = vld [vmem:[#allocation2 + $0x10] sm:$0xff]  ;;  %v1561_v61 = vpop.eup %1560  ;;  %v1126_v37 = vld [vmem:[#allocation2 + $0x40] sm:$0xff] }
 0x1c9   :  { %v1121_v26 = vld [vmem:[#allocation2 + $0x18] sm:$0xff]  ;;  %960 = vst.msk [vmem:[#allocation3 + $0x28] sm:$0xff] %vm3040_vm7, %v944_v28  ;;  %v1199_v23 = vmul.f32 0.6931472, %v1561_v61  ;;  %vm3050_vm7 = vmmov %vm3026_vm0  ;;  %v800_v28 = vld [vmem:[#allocation2 + $0x30] sm:$0xff] }
 0x1ca   :  { %v1231_v2 = vsub.f32 %v1137_v59, %v1201_v63  ;;  %1566 = vlog2.f32 %v1121_v26  ;;  %957 = vst.msk [vmem:[#allocation3 + $0x10] sm:$0xff] %vm3041_vm11, %v941_v21  ;;  %v934_v16 = vpop.xlane.xlu1 %933  ;;  %vm3052_vm11 = vmmov %vm3026_vm0  ;;  %v801_v63 = vld [vmem:[#allocation2 + $0x38] sm:$0xff] }
 0x1cb   :  { %v952_v52 = vadd.f32 %v934_v16, %v904_v46  ;;  %v928_v50 = vpop.xlane.xlu0 %927  ;;  %1568 = vlog2.f32 %v1120_v19 }
 0x1cc   :  { %v1247_v6 = vsel %vm1103_vm15, %v1231_v2, 0.0  ;;  %v949_v17 = vadd.f32 %v928_v50, %v901_v45  ;;  %vm3045_vm15 = vmmov %vm3026_vm0 }
 0x1cd   :  { %1263 = vst.msk [vmem:[%s2854_s7 + $0x8] sm:$0xff] %vm3042_vm8, %v1247_v6  ;;  %vm3053_vm8 = vmmov %vm3026_vm0  ;;  %v1128_v6 = vld [vmem:[#allocation2 + $0x50] sm:$0xff]  ;;  %v1129_v41 = vld [vmem:[#allocation2 + $0x58] sm:$0xff] }
 0x1ce   :  { %968 = vst.msk [vmem:[#allocation3 + $0x68] sm:$0xff] %vm3043_vm13, %v952_v52  ;;  %v835_v18 = vpop.xlane.xlu1 %834  ;;  %v808_v52 = vld [vmem:[#allocation2 + $0x70] sm:$0xff]  ;;  %vm3055_vm13 = vmmov %vm3026_vm0 }
 0x1cf   :  { %965 = vst.msk [vmem:[#allocation3 + $0x50] sm:$0xff] %vm3044_vm3, %v949_v17  ;;  %v862_v47 = vadd.f32 %v835_v18, %v798_v8  ;;  %v837_v34 = vpop.xlane.xlu0 %836  ;;  %v809_v8 = vld [vmem:[#allocation2 + $0x78] sm:$0xff]  ;;  %vm3056_vm3 = vmmov %vm3026_vm0 }
 0x1d0   :  { %v863_v24 = vadd.f32 %v837_v34, %v799_v60  ;;  %v1171_v22 = vld [vmem:[#allocation3 + $0x28] sm:$0xff] }
 0x1d1   :  { %v1168_v3 = vld [vmem:[#allocation3 + $0x10] sm:$0xff]  ;;  %879 = vst.msk [vmem:[#allocation2 + $0x20] sm:$0xff] %vm3045_vm15, %v862_v47  ;;  %v1187_v38 = vadd.f32 1e-08, %v1171_v22  ;;  %v1127_v34 = vld [vmem:[#allocation2 + $0x48] sm:$0xff]  ;;  %vm3057_vm15 = vmmov %vm3026_vm0 }
 0x1d2   :  { %v1184_v49 = vadd.f32 1e-08, %v1168_v3  ;;  %880 = vst.msk [vmem:[#allocation2 + $0x28] sm:$0xff] %vm3026_vm0, %v863_v24  ;;  %v851_v12 = vpop.xlane.xlu1 %850  ;;  %v1175_v22 = vld [vmem:[#allocation3 + $0x48] sm:$0xff] }
 0x1d3   :  { %v1563_v39 = vpop.eup %1562  ;;  %v870_v54 = vadd.f32 %v851_v12, %v806_v62  ;;  %v853_v1 = vpop.xlane.xlu0 %852 }
 0x1d4   :  { %v1565_v25 = vpop.eup %1564  ;;  %v1135_v33 = vmul.f32 0.6931472, %v1563_v39  ;;  %1570 = vlog2.f32 %v1184_v49  ;;  %v871_v43 = vadd.f32 %v853_v1, %v807_v30  ;;  %v977_v49 = vld [vmem:[#allocation4 + $0x30] sm:$0xff] }
 0x1d5   :  { %887 = vst.msk [vmem:[#allocation2 + $0x60] sm:$0xff] %vm3046_vm6, %v870_v54  ;;  %v1205_v9 = vmul.f32 0.6931472, %v1565_v25  ;;  %1572 = vlog2.f32 %v1187_v38  ;;  %vm3059_vm6 = vmmov %vm3026_vm0 }
 0x1d6   :  { %v1230_v29 = vsub.f32 %v1135_v33, %v1199_v23  ;;  %888 = vst.msk [vmem:[#allocation2 + $0x68] sm:$0xff] %vm3047_vm9, %v871_v43  ;;  %v922_v5 = vpop.xlane.xlu1 %921  ;;  %v1176_v20 = vld [vmem:[#allocation3 + $0x50] sm:$0xff]  ;;  %v1191_v43 = vadd.f32 1e-08, %v1175_v22  ;;  %vm3060_vm9 = vmmov %vm3026_vm0 }
 0x1d7   :  { %v1567_v10 = vpop.eup %1566  ;;  %v946_v7 = vadd.f32 %v922_v5, %v898_v42  ;;  %v916_v31 = vpop.xlane.xlu0 %915  ;;  %v1192_v40 = vadd.f32 1e-08, %v1176_v20  ;;  %v897_v23 = vld [vmem:[#allocation3 + $0x30] sm:$0xff] }
 0x1d8   :  { %v1246_v15 = vsel %vm1102_vm14, %v1230_v29, 0.0  ;;  %v1141_v32 = vmul.f32 0.6931472, %v1567_v10  ;;  %v943_v36 = vadd.f32 %v916_v31, %v895_v0  ;;  %vm3051_vm14 = vmmov %vm3026_vm0  ;;  %v1122_v59 = vld [vmem:[#allocation2 + $0x20] sm:$0xff]  ;;  %v1569_v46 = vpop.eup %1568  ;;  %v1177_v29 = vld [vmem:[#allocation3 + $0x58] sm:$0xff] }
 0x1d9   :  { %1262 = vst.msk [vmem:[%s2854_s7] sm:$0xff] %vm3048_vm10, %v1246_v15  ;;  %v1123_v35 = vld [vmem:[#allocation2 + $0x28] sm:$0xff]  ;;  %v1139_v60 = vmul.f32 0.6931472, %v1569_v46  ;;  %v905_v31 = vld [vmem:[#allocation3 + $0x70] sm:$0xff]  ;;  %vm3061_vm10 = vmmov %vm3026_vm0 }
 0x1da   :  { %962 = vst.msk [vmem:[#allocation3 + $0x38] sm:$0xff] %vm3049_vm4, %v946_v7  ;;  %v1233_v13 = vsub.f32 %v1141_v32, %v1205_v9  ;;  %1574 = vlog2.f32 %v1123_v35  ;;  %v938_v55 = vpop.xlane.xlu1 %937  ;;  %v979_v9 = vld [vmem:[#allocation4 + $0x40] sm:$0xff]  ;;  %vm3062_vm4 = vmmov %vm3026_vm0 }
 0x1db   :  { %959 = vst.msk [vmem:[#allocation3 + $0x20] sm:$0xff] %vm3050_vm7, %v943_v36  ;;  %v954_v57 = vadd.f32 %v938_v55, %v906_v14  ;;  %v932_v44 = vpop.xlane.xlu0 %931  ;;  %1576 = vlog2.f32 %v1190_v53  ;;  %v1193_v36 = vadd.f32 1e-08, %v1177_v29  ;;  %vm3063_vm7 = vmmov %vm3026_vm0 }
 0x1dc   :  { %v1249_v56 = vsel %vm1105_vm2, %v1233_v13, 0.0  ;;  %v951_v58 = vadd.f32 %v932_v44, %v903_v51  ;;  %1578 = vlog2.f32 %v1126_v37  ;;  %vm3054_vm2 = vmmov %vm3026_vm0  ;;  %v1130_v1 = vld [vmem:[#allocation2 + $0x60] sm:$0xff]  ;;  %v1179_v13 = vld [vmem:[#allocation3 + $0x68] sm:$0xff] }
 0x1dd   :  { %1265 = vst.msk [vmem:[%s2854_s7 + $0x18] sm:$0xff] %vm3051_vm14, %v1249_v56  ;;  %1580 = vlog2.f32 %v1122_v59  ;;  %v978_v56 = vld [vmem:[#allocation4 + $0x38] sm:$0xff]  ;;  %vm3064_vm14 = vmmov %vm3026_vm0 }
 0x1de   :  { %970 = vst.msk [vmem:[#allocation3 + $0x78] sm:$0xff] %vm3052_vm11, %v954_v57  ;;  %v839_v21 = vpop.xlane.xlu1 %838  ;;  %1582 = vlog2.f32 %v1192_v40  ;;  %v981_v57 = vld [vmem:[#allocation4 + $0x50] sm:$0xff]  ;;  %vm3065_vm11 = vmmov %vm3026_vm0 }
 0x1df   :  { %967 = vst.msk [vmem:[#allocation3 + $0x60] sm:$0xff] %vm3053_vm8, %v951_v58  ;;  %v864_v26 = vadd.f32 %v839_v21, %v800_v28  ;;  %v841_v45 = vpop.xlane.xlu0 %840  ;;  %v1131_v58 = vld [vmem:[#allocation2 + $0x68] sm:$0xff] }
 0x1e0   :  { %v865_v16 = vadd.f32 %v841_v45, %v801_v63  ;;  %v1195_v63 = vadd.f32 1e-08, %v1179_v13 }
 0x1e1   :  { %v1173_v2 = vld [vmem:[#allocation3 + $0x38] sm:$0xff]  ;;  %v1571_v50 = vpop.eup %1570  ;;  %881 = vst.msk [vmem:[#allocation2 + $0x30] sm:$0xff] %vm3054_vm2, %v864_v26  ;;  %vm3066_vm2 = vmmov %vm3026_vm0 }
 0x1e2   :  { %v1170_v17 = vld [vmem:[#allocation3 + $0x20] sm:$0xff]  ;;  %v1203_v18 = vmul.f32 0.6931472, %v1571_v50  ;;  %882 = vst.msk [vmem:[#allocation2 + $0x38] sm:$0xff] %vm3055_vm13, %v865_v16  ;;  %v855_v47 = vpop.xlane.xlu1 %854  ;;  %v1189_v61 = vadd.f32 1e-08, %v1173_v2  ;;  %v1573_v12 = vpop.eup %1572  ;;  %vm3067_vm13 = vmmov %vm3026_vm0 }
 0x1e3   :  { %v1186_v19 = vadd.f32 1e-08, %v1170_v17  ;;  %v872_v24 = vadd.f32 %v855_v47, %v808_v52  ;;  %v857_v62 = vpop.xlane.xlu0 %856  ;;  %v1209_v5 = vmul.f32 0.6931472, %v1573_v12  ;;  %v983_v16 = vld [vmem:[#allocation4 + $0x60] sm:$0xff]  ;;  %v980_v52 = vld [vmem:[#allocation4 + $0x48] sm:$0xff] }
 0x1e4   :  { %v1232_v3 = vsub.f32 %v1139_v60, %v1203_v18  ;;  %v873_v30 = vadd.f32 %v857_v62, %v809_v8 }
 0x1e5   :  { %1584 = vlog2.f32 %v1186_v19  ;;  %889 = vst.msk [vmem:[#allocation2 + $0x70] sm:$0xff] %vm3056_vm3, %v872_v24  ;;  %v1181_v28 = vld [vmem:[#allocation3 + $0x78] sm:$0xff]  ;;  %vm3068_vm3 = vmmov %vm3026_vm0 }
 0x1e6   :  { %1586 = vlog2.f32 %v1128_v6  ;;  %v1178_v39 = vld [vmem:[#allocation3 + $0x60] sm:$0xff]  ;;  %v1248_v54 = vsel %vm1104_vm12, %v1232_v3, 0.0  ;;  %890 = vst.msk [vmem:[#allocation2 + $0x78] sm:$0xff] %vm3057_vm15, %v873_v30  ;;  %v1032_v33 = vpop.xlane.xlu1 %1031  ;;  %vm3058_vm12 = vmmov %vm3026_vm0  ;;  %v1197_v17 = vadd.f32 1e-08, %v1181_v28 }
 0x1e7   :  { %1588 = vlog2.f32 %v1127_v34  ;;  %v1194_v25 = vadd.f32 1e-08, %v1178_v39  ;;  %v1575_v38 = vpop.eup %1574  ;;  %1264 = vst.msk [vmem:[%s2854_s7 + $0x10] sm:$0xff] %vm3026_vm0, %v1248_v54  ;;  %v1057_v42 = vadd.f32 %v1032_v33, %v977_v49  ;;  %v920_v0 = vpop.xlane.xlu0 %919  ;;  %vm3069_vm15 = vmmov %vm3026_vm0 }
 0x1e8   :  { %1590 = vlog2.f32 %v1189_v61  ;;  %v1145_v10 = vmul.f32 0.6931472, %v1575_v38  ;;  %v945_v4 = vadd.f32 %v920_v0, %v897_v23  ;;  %v1577_v51 = vpop.eup %1576  ;;  %v1124_v59 = vld [vmem:[#allocation2 + $0x30] sm:$0xff] }
 0x1e9   :  { %1592 = vlog2.f32 %v1194_v25  ;;  %v1125_v7 = vld [vmem:[#allocation2 + $0x38] sm:$0xff]  ;;  %1073 = vst.msk [vmem:[#allocation4 + $0x30] sm:$0xff] %vm3058_vm12, %v1057_v42  ;;  %v1579_v44 = vpop.eup %1578  ;;  %v1215_v48 = vmul.f32 0.6931472, %v1577_v51  ;;  %v984_v51 = vld [vmem:[#allocation4 + $0x68] sm:$0xff] }
 0x1ea   :  { %1594 = vlog2.f32 %v1130_v1  ;;  %v1235_v15 = vsub.f32 %v1145_v10, %v1209_v5  ;;  %961 = vst.msk [vmem:[#allocation3 + $0x30] sm:$0xff] %vm3059_vm6, %v945_v4  ;;  %v1036_v32 = vpop.xlane.xlu1 %1035  ;;  %v1581_v20 = vpop.eup %1580  ;;  %v1151_v26 = vmul.f32 0.6931472, %v1579_v44  ;;  %v985_v1 = vld [vmem:[#allocation4 + $0x70] sm:$0xff] }
 0x1eb   :  { %1596 = vlog2.f32 %v1125_v7  ;;  %v1059_v14 = vadd.f32 %v1036_v32, %v979_v9  ;;  %v936_v35 = vpop.xlane.xlu0 %935  ;;  %v1583_v40 = vpop.eup %1582  ;;  %v1143_v6 = vmul.f32 0.6931472, %v1581_v20 }
 0x1ec   :  { %1598 = vlog2.f32 %v1191_v43  ;;  %v1251_v55 = vsel %vm1107_vm5, %v1235_v15, 0.0  ;;  %v953_v53 = vadd.f32 %v936_v35, %v905_v31  ;;  %v1238_v62 = vsub.f32 %v1151_v26, %v1215_v48  ;;  %v1132_v39 = vld [vmem:[#allocation2 + $0x70] sm:$0xff]  ;;  %v982_v43 = vld [vmem:[#allocation4 + $0x58] sm:$0xff] }
 0x1ed   :  { %1600 = vlog2.f32 %v1129_v41  ;;  %1267 = vst.msk [vmem:[%s2854_s7 + $0x28] sm:$0xff] %vm3060_vm9, %v1251_v55  ;;  %v1133_v19 = vld [vmem:[#allocation2 + $0x78] sm:$0xff]  ;;  %v1219_v49 = vmul.f32 0.6931472, %v1583_v40 }
 0x1ee   :  { %1075 = vst.msk [vmem:[#allocation4 + $0x40] sm:$0xff] %vm3061_vm10, %v1059_v14  ;;  %v1040_v37 = vpop.xlane.xlu1 %1039  ;;  %1602 = vlog2.f32 %v1193_v36 }
 0x1ef   :  { %969 = vst.msk [vmem:[#allocation3 + $0x70] sm:$0xff] %vm3062_vm4, %v953_v53  ;;  %v1061_v21 = vadd.f32 %v1040_v37, %v981_v57  ;;  %v1034_v46 = vpop.xlane.xlu0 %1033  ;;  %1604 = vlog2.f32 %v1131_v58 }
 0x1f0   :  { %v2733_v45 = vld [vmem:[#allocation4 + $0x30] sm:$0xff]  ;;  %v1058_v2 = vadd.f32 %v1034_v46, %v978_v56  ;;  %1606 = vlog2.f32 %v1124_v59 }
 0x1f1   :  { %vm1108_vm5 = vcmp.gt.f32.partialorder %v2733_v45, 0.0  ;;  %v1172_v8 = vld [vmem:[#allocation3 + $0x30] sm:$0xff]  ;;  %1077 = vst.msk [vmem:[#allocation4 + $0x50] sm:$0xff] %vm3063_vm7, %v1061_v21  ;;  %1608 = vlog2.f32 %v1195_v63 }
 0x1f2   :  { %v1585_v50 = vpop.eup %1584  ;;  %v1358_v47 = vsel %vm1108_vm5, 1.0, %v3016_v27  ;;  %v1188_v34 = vadd.f32 1e-08, %v1172_v8  ;;  %1074 = vst.msk [vmem:[#allocation4 + $0x38] sm:$0xff] %vm3064_vm14, %v1058_v2  ;;  %v1044_v61 = vpop.xlane.xlu1 %1043 }
 0x1f3   :  { %v1587_v60 = vpop.eup %1586  ;;  %v1207_v18 = vmul.f32 0.6931472, %v1585_v50  ;;  %1316 = vst.msk [vmem:[%s2853_s8 + $0x30] sm:$0xff] %vm3065_vm11, %v1358_v47  ;;  %v1063_v22 = vadd.f32 %v1044_v61, %v983_v16  ;;  %v1038_v3 = vpop.xlane.xlu0 %1037  ;;  %v986_v16 = vld [vmem:[#allocation4 + $0x78] sm:$0xff] }
 0x1f4   :  { %v1589_v24 = vpop.eup %1588  ;;  %1610 = vlog2.f32 %v1188_v34  ;;  %v1060_v54 = vadd.f32 %v1038_v3, %v980_v52  ;;  %v1155_v33 = vmul.f32 0.6931472, %v1587_v60 }
 0x1f5   :  { %v1591_v30 = vpop.eup %1590  ;;  %v1234_v12 = vsub.f32 %v1143_v6, %v1207_v18  ;;  %v1094_v23 = vld [vmem:[#allocation4 + $0x40] sm:$0xff]  ;;  %1612 = vlog2.f32 %v1133_v19  ;;  %1079 = vst.msk [vmem:[#allocation4 + $0x60] sm:$0xff] %vm3066_vm2, %v1063_v22  ;;  %v1153_v13 = vmul.f32 0.6931472, %v1589_v24 }
 0x1f6   :  { %v1593_v25 = vpop.eup %1592  ;;  %vm1110_vm8 = vcmp.gt.f32.partialorder %v1094_v23, 0.0  ;;  %v1180_v38 = vld [vmem:[#allocation3 + $0x70] sm:$0xff]  ;;  %1614 = vlog2.f32 %v1197_v17  ;;  %1076 = vst.msk [vmem:[#allocation4 + $0x48] sm:$0xff] %vm3067_vm13, %v1060_v54  ;;  %v1048_v10 = vpop.xlane.xlu1 %1047  ;;  %v1213_v9 = vmul.f32 0.6931472, %v1591_v30  ;;  %v1240_v14 = vsub.f32 %v1155_v33, %v1219_v49 }
 0x1f7   :  { %v1595_v42 = vpop.eup %1594  ;;  %v1250_v0 = vsel %vm1106_vm1, %v1234_v12, 0.0  ;;  %v1254_v29 = vsel %vm1110_vm8, %v1238_v62, 0.0  ;;  %v1360_v5 = vsel %vm1110_vm8, 1.0, %v3016_v27  ;;  %1616 = vlog2.f32 %v1132_v39  ;;  %vm3070_vm1 = vmmov %vm3026_vm0  ;;  %v1042_v31 = vpop.xlane.xlu0 %1041 }
 0x1f8   :  { %v1597_v4 = vpop.eup %1596  ;;  %1266 = vst.msk [vmem:[%s2854_s7 + $0x20] sm:$0xff] %vm3068_vm3, %v1250_v0  ;;  %v1196_v11 = vadd.f32 1e-08, %v1180_v38  ;;  %v1065_v7 = vadd.f32 %v1048_v10, %v985_v1  ;;  %v1223_v15 = vmul.f32 0.6931472, %v1593_v25  ;;  %v1096_v36 = vld [vmem:[#allocation4 + $0x50] sm:$0xff]  ;;  %v1062_v35 = vadd.f32 %v1042_v31, %v982_v43  ;;  %vm3071_vm12 = vmmov %vm3070_vm1 }
 0x1f9   :  { %1270 = vst.msk [vmem:[%s2854_s7 + $0x40] sm:$0xff] %vm3069_vm15, %v1254_v29  ;;  %v1599_v41 = vpop.eup %1598  ;;  %v1149_v32 = vmul.f32 0.6931472, %v1597_v4  ;;  %v1159_v55 = vmul.f32 0.6931472, %v1595_v42  ;;  %vm1112_vm0 = vcmp.gt.f32.partialorder %v1096_v36, 0.0  ;;  %vm3072_vm9 = vmmov %vm3070_vm1 }
 0x1fa   :  { %1318 = vst.msk [vmem:[%s2853_s8 + $0x40] sm:$0xff] %vm3070_vm1, %v1360_v5  ;;  %1618 = vlog2.f32 %v1196_v11  ;;  %v1093_v53 = vld [vmem:[#allocation4 + $0x38] sm:$0xff]  ;;  %v1601_v57 = vpop.eup %1600  ;;  %v1256_v44 = vsel %vm1112_vm0, %v1240_v14, 0.0  ;;  %v1362_v56 = vsel %vm1112_vm0, 1.0, %v3016_v27  ;;  %v1217_v58 = vmul.f32 0.6931472, %v1599_v41  ;;  %vm3073_vm10 = vmmov %vm3070_vm1 }
 0x1fb   :  { %1081 = vst.msk [vmem:[#allocation4 + $0x70] sm:$0xff] %vm3071_vm12, %v1065_v7  ;;  %v1237_v20 = vsub.f32 %v1149_v32, %v1213_v9  ;;  %vm1109_vm6 = vcmp.gt.f32.partialorder %v1093_v53, 0.0  ;;  %vm3074_vm4 = vmmov %vm3070_vm1  ;;  %v1046_v37 = vpop.xlane.xlu0 %1045  ;;  %v1603_v48 = vpop.eup %1602  ;;  %v1242_v21 = vsub.f32 %v1159_v55, %v1223_v15  ;;  %v1157_v40 = vmul.f32 0.6931472, %v1601_v57 }
 0x1fc   :  { %1078 = vst.msk [vmem:[#allocation4 + $0x58] sm:$0xff] %vm3072_vm9, %v1062_v35  ;;  %v1359_v28 = vsel %vm1109_vm6, 1.0, %v3016_v27  ;;  %vm3075_vm7 = vmmov %vm3070_vm1  ;;  %v1098_v59 = vld [vmem:[#allocation4 + $0x60] sm:$0xff]  ;;  %v1064_v46 = vadd.f32 %v1046_v37, %v984_v51  ;;  %v1239_v26 = vsub.f32 %v1153_v13, %v1217_v58  ;;  %v1605_v52 = vpop.eup %1604  ;;  %v1221_v8 = vmul.f32 0.6931472, %v1603_v48 }
 0x1fd   :  { %1272 = vst.msk [vmem:[%s2854_s7 + $0x50] sm:$0xff] %vm3073_vm10, %v1256_v44  ;;  %v1253_v63 = vsel %vm1109_vm6, %v1237_v20, 0.0  ;;  %vm3076_vm14 = vmmov %vm3070_vm1  ;;  %vm1114_vm11 = vcmp.gt.f32.partialorder %v1098_v59, 0.0  ;;  %v1095_v2 = vld [vmem:[#allocation4 + $0x48] sm:$0xff]  ;;  %v1607_v17 = vpop.eup %1606  ;;  %v1161_v62 = vmul.f32 0.6931472, %v1605_v52 }
 0x1fe   :  { %1320 = vst.msk [vmem:[%s2853_s8 + $0x50] sm:$0xff] %vm3074_vm4, %v1362_v56  ;;  %v1258_v50 = vsel %vm1114_vm11, %v1242_v21, 0.0  ;;  %v1364_v6 = vsel %vm1114_vm11, 1.0, %v3016_v27  ;;  %vm1111_vm8 = vcmp.gt.f32.partialorder %v1095_v2, 0.0  ;;  %vm3077_vm2 = vmmov %vm3070_vm1  ;;  %v1609_v47 = vpop.eup %1608  ;;  %v1241_v22 = vsub.f32 %v1157_v40, %v1221_v8 }
 0x1ff   :  { %1317 = vst.msk [vmem:[%s2853_s8 + $0x38] sm:$0xff] %vm3075_vm7, %v1359_v28  ;;  %vm3078_vm13 = vmmov %vm3070_vm1  ;;  %v1255_v60 = vsel %vm1111_vm8, %v1239_v26, 0.0  ;;  %v1361_v18 = vsel %vm1111_vm8, 1.0, %v3016_v27  ;;  %v1050_v19 = vpop.xlane.xlu0 %1049  ;;  %v1147_v49 = vmul.f32 0.6931472, %v1607_v17 }
 0x200   :  { %1269 = vst.msk [vmem:[%s2854_s7 + $0x38] sm:$0xff] %vm3076_vm14, %v1253_v63  ;;  %vm3079_vm3 = vmmov %vm3070_vm1  ;;  %v1066_v61 = vadd.f32 %v1050_v19, %v986_v16  ;;  %v1225_v54 = vmul.f32 0.6931472, %v1609_v47 }
 0x201   :  { %1080 = vst.msk [vmem:[#allocation4 + $0x68] sm:$0xff] %vm3077_vm2, %v1064_v46  ;;  %vm3080_vm15 = vmmov %vm3070_vm1  ;;  %v1611_v24 = vpop.eup %1610 }
 0x202   :  { %1274 = vst.msk [vmem:[%s2854_s7 + $0x60] sm:$0xff] %vm3078_vm13, %v1258_v50  ;;  %v1100_v34 = vld [vmem:[#allocation4 + $0x70] sm:$0xff]  ;;  %v1613_v30 = vpop.eup %1612  ;;  %v1211_v12 = vmul.f32 0.6931472, %v1611_v24  ;;  %vm3081_vm6 = vmmov %vm3070_vm1  ;;  %v1243_v42 = vsub.f32 %v1161_v62, %v1225_v54 }
 0x203   :  { %1322 = vst.msk [vmem:[%s2853_s8 + $0x60] sm:$0xff] %vm3079_vm3, %v1364_v6  ;;  %vm1116_vm0 = vcmp.gt.f32.partialorder %v1100_v34, 0.0  ;;  %v1097_v3 = vld [vmem:[#allocation4 + $0x58] sm:$0xff]  ;;  %v1615_v23 = vpop.eup %1614  ;;  %vm3082_vm9 = vmmov %vm3070_vm1  ;;  %v1165_v43 = vmul.f32 0.6931472, %v1613_v30 }
 0x204   :  { %1271 = vst.msk [vmem:[%s2854_s7 + $0x48] sm:$0xff] %vm3080_vm15, %v1255_v60  ;;  %v1366_v39 = vsel %vm1116_vm0, 1.0, %v3016_v27  ;;  %vm1113_vm12 = vcmp.gt.f32.partialorder %v1097_v3, 0.0  ;;  %v1617_v33 = vpop.eup %1616  ;;  %v1236_v38 = vsub.f32 %v1147_v49, %v1211_v12  ;;  %vm3083_vm10 = vmmov %vm3070_vm1  ;;  %v1229_v5 = vmul.f32 0.6931472, %v1615_v23 }
 0x205   :  { %1319 = vst.msk [vmem:[%s2853_s8 + $0x48] sm:$0xff] %vm3070_vm1, %v1361_v18  ;;  %v1257_v1 = vsel %vm1113_vm12, %v1241_v22, 0.0  ;;  %v1363_v25 = vsel %vm1113_vm12, 1.0, %v3016_v27  ;;  %vm3084_vm4 = vmmov %vm3070_vm1  ;;  %v1163_v4 = vmul.f32 0.6931472, %v1617_v33 }
 0x206   :  { %1082 = vst.msk [vmem:[#allocation4 + $0x78] sm:$0xff] %vm3081_vm6, %v1066_v61  ;;  %v1252_v10 = vsel %vm1108_vm5, %v1236_v38, 0.0  ;;  %vm3085_vm14 = vmmov %vm3070_vm1  ;;  %v1245_v31 = vsub.f32 %v1165_v43, %v1229_v5 }
 0x207   :  { %1324 = vst.msk [vmem:[%s2853_s8 + $0x70] sm:$0xff] %vm3082_vm9, %v1366_v39  ;;  %v1619_v29 = vpop.eup %1618  ;;  %vm3086_vm11 = vmmov %vm3070_vm1 }
 0x208   :  { %1273 = vst.msk [vmem:[%s2854_s7 + $0x58] sm:$0xff] %vm3083_vm10, %v1257_v1  ;;  %v1099_v0 = vld [vmem:[#allocation4 + $0x68] sm:$0xff]  ;;  %v1227_v9 = vmul.f32 0.6931472, %v1619_v29  ;;  %vm3087_vm8 = vmmov %vm3070_vm1 }
 0x209   :  { %1321 = vst.msk [vmem:[%s2853_s8 + $0x58] sm:$0xff] %vm3084_vm4, %v1363_v25  ;;  %vm1115_vm7 = vcmp.gt.f32.partialorder %v1099_v0, 0.0  ;;  %vm3088_vm2 = vmmov %vm3070_vm1 }
 0x20a   :  { %1268 = vst.msk [vmem:[%s2854_s7 + $0x30] sm:$0xff] %vm3085_vm14, %v1252_v10  ;;  %v1259_v11 = vsel %vm1115_vm7, %v1243_v42, 0.0  ;;  %v1365_v7 = vsel %vm1115_vm7, 1.0, %v3016_v27  ;;  %v1244_v45 = vsub.f32 %v1163_v4, %v1227_v9  ;;  %vm3089_vm13 = vmmov %vm3070_vm1 }
 0x20b   :  { %1275 = vst.msk [vmem:[%s2854_s7 + $0x68] sm:$0xff] %vm3086_vm11, %v1259_v11  ;;  %vm3090_vm3 = vmmov %vm3070_vm1 }
 0x20c   :  { %1323 = vst.msk [vmem:[%s2853_s8 + $0x68] sm:$0xff] %vm3087_vm8, %v1365_v7  ;;  %v1260_v15 = vsel %vm1116_vm0, %v1244_v45, 0.0 }
 0x20d   :  { %v1101_v41 = vld [vmem:[#allocation4 + $0x78] sm:$0xff]  ;;  %1276 = vst.msk [vmem:[%s2854_s7 + $0x70] sm:$0xff] %vm3088_vm2, %v1260_v15 }
 0x20e   :  { %vm1117_vm5 = vcmp.gt.f32.partialorder %v1101_v41, 0.0 }
 0x20f   :  { %v1261_v32 = vsel %vm1117_vm5, %v1245_v31, 0.0  ;;  %v1367_v36 = vsel %vm1117_vm5, 1.0, %v3016_v27 }
 0x210   :  { %1277 = vst.msk [vmem:[%s2854_s7 + $0x78] sm:$0xff] %vm3089_vm13, %v1261_v32 }
 0x211   :  { %1325 = vst.msk [vmem:[%s2853_s8 + $0x78] sm:$0xff] %vm3090_vm3, %v1367_v36 }

</bundles_post_ra>
